<compile_context>
chip_gen: v7x
topology: tpu7x:2x2x1
jax: 0.10.0
libtpu: 0.0.40
codegen_flags: <defaults>
</compile_context>

<pallas_src>
import numpy as np

import jax
import jax.numpy as jnp
from jax import lax
from jax.experimental import pallas as pl
from jax.experimental.pallas import tpu as pltpu


_VMEM_LIMIT = 28 * 1024 * 1024  # explicit scoped-VMEM cap; safe on v5e/v6e/v7x


# ------------------------- fully fused network kernel ------------------------

def _cnn_fused_kernel(x_ref, w1_ref, b1_ref, w2_ref, b2_ref, wfc_ref, bfc_ref,
                      o_ref):
    """conv1+ReLU+pool -> conv2+ReLU+pool -> fc for one batch tile, all in VMEM.

    x_ref  : (TB, 28, 28)   bf16   input slab (Cin=1)
    w1_ref : (140, 384)     bf16   folded conv1 weight (K*W*Cin, Wo*Cout), cols
                                   permuted even-wo | odd-wo
    b1_ref : (1, 384)       f32
    w2_ref : (960, 256)     bf16   folded conv2 weight, cols permuted
    b2_ref : (1, 256)       f32
    wfc_ref: (512, 128)     bf16   fc weight in (h,w,c) row order, padded 10->128
    bfc_ref: (1, 128)       f32
    o_ref  : (TB, 128)      f32    padded logits (first 10 lanes are real)
    """
    TB = x_ref.shape[0]
    K = 5

    # ---- layer 1: conv 5x5 (1->16), im2col folded over kh into one matmul ----
    x = x_ref[...]                                               # load slab once
    lhs1 = jnp.concatenate([x[:, kh:kh + 24, :] for kh in range(K)], axis=-1)
    lhs1 = lhs1.reshape(TB * 24, K * 28)                         # (TB*24, 140)
    a1 = jnp.dot(lhs1, w1_ref[...], preferred_element_type=jnp.float32)
    a1 = jnp.maximum(a1 + b1_ref[...], 0.0).astype(jnp.bfloat16)  # (TB*24, 384)

    # ---- maxpool1 2x2/2: width = max of the two contiguous column halves
    #      (weight columns were permuted even|odd at init); height = pair max.
    wm1 = jnp.maximum(a1[:, :192], a1[:, 192:])                  # (TB*24, 192)
    wm1 = wm1.reshape(TB * 12, 2, 192)
    p1 = jnp.maximum(wm1[:, 0:1, :], wm1[:, 1:2, :])             # (TB*12, 1, 192)
    p1 = p1.reshape(TB, 12, 192)                                 # (b, hp, wp*16+c)

    # ---- layer 2: conv 5x5 (16->32), folded im2col ----
    lhs2 = jnp.concatenate([p1[:, kh:kh + 8, :] for kh in range(K)], axis=-1)
    lhs2 = lhs2.reshape(TB * 8, K * 192)                         # (TB*8, 960)
    a2 = jnp.dot(lhs2, w2_ref[...], preferred_element_type=jnp.float32)
    a2 = jnp.maximum(a2 + b2_ref[...], 0.0).astype(jnp.bfloat16)  # (TB*8, 256)

    # ---- maxpool2: two perfectly 128-aligned halves, then pair max ----
    wm2 = jnp.maximum(a2[:, :128], a2[:, 128:])                  # (TB*8, 128)
    wm2 = wm2.reshape(TB * 4, 2, 128)
    p2 = jnp.maximum(wm2[:, 0:1, :], wm2[:, 1:2, :])             # (TB*4, 1, 128)
    p2 = p2.reshape(TB, 4, 128)                                  # (b, hp, wp*32+c)

    # ---- fc: flatten (h, w, c) onto the lane axis; outputs padded 10->128 ----
    flat = jnp.concatenate([p2[:, hp:hp + 1, :] for hp in range(4)], axis=2)
    flat = flat.reshape(TB, 512)
    out = jnp.dot(flat, wfc_ref[...], preferred_element_type=jnp.float32)
    o_ref[...] = out + bfc_ref[...]                              # (TB, 128) f32


def cnn_model_forward(x_nchw, params, *, tile_b=128):
    """x_nchw: (B, 1, 28, 28) float; returns (B, 10) float32 logits."""
    B = x_nchw.shape[0]
    x = x_nchw.reshape(B, 28, 28).astype(jnp.bfloat16)
    # NOTE: for megacore (v7x) benefit keep B >= 2*tile_b so the grid has >= 2 steps.
    tb = max(1, min(tile_b, B))
    out = pl.pallas_call(
        _cnn_fused_kernel,
        out_shape=jax.ShapeDtypeStruct((B, 128), jnp.float32),
        grid=(pl.cdiv(B, tb),),
        in_specs=[
            pl.BlockSpec((tb, 28, 28), lambda i: (i, 0, 0)),
            pl.BlockSpec((140, 384), lambda i: (0, 0)),
            pl.BlockSpec((1, 384), lambda i: (0, 0)),
            pl.BlockSpec((960, 256), lambda i: (0, 0)),
            pl.BlockSpec((1, 256), lambda i: (0, 0)),
            pl.BlockSpec((512, 128), lambda i: (0, 0)),
            pl.BlockSpec((1, 128), lambda i: (0, 0)),
        ],
        out_specs=pl.BlockSpec((tb, 128), lambda i: (i, 0)),
        compiler_params=pltpu.CompilerParams(
            dimension_semantics=("parallel",),
            vmem_limit_bytes=_VMEM_LIMIT),
    )(x, params["w1"], params["b1"], params["w2"], params["b2"],
      params["wfc"], params["bfc"])
    return out[:, :10]


# ----------------------- one-time weight re-layout (init) --------------------

def _fold_conv_weight(w_oikk, W):
    """PyTorch (Cout,Cin,K,K) -> folded banded matrix (K*W*Cin, Wo*Cout).

    Output columns are permuted so all even-wo channel groups occupy the first
    Wp*Cout columns and all odd-wo groups the last Wp*Cout columns, making the
    2x2 width max-pool a max of two contiguous lane halves.
    """
    Cout, Cin, K, _ = w_oikk.shape
    Wo = W - K + 1
    Wp = Wo // 2
    out = np.zeros((K * W * Cin, Wo * Cout), np.float32)
    for wo in range(Wo):
        half = 0 if wo % 2 == 0 else Wp * Cout
        col0 = half + (wo // 2) * Cout
        for kh in range(K):
            for kw in range(K):
                wi = wo + kw
                r0 = kh * W * Cin + wi * Cin
                out[r0:r0 + Cin, col0:col0 + Cout] = w_oikk[:, :, kh, kw].T
    return out


def prepare_params(raw):
    w1 = np.asarray(raw["w1"], np.float32)
    b1 = np.asarray(raw["b1"], np.float32)
    w2 = np.asarray(raw["w2"], np.float32)
    b2 = np.asarray(raw["b2"], np.float32)
    wfc = np.asarray(raw["wfc"], np.float32)
    bfc = np.asarray(raw["bfc"], np.float32)
    # fc: fold PyTorch's NCHW (c,h,w) flatten order into our (h,w,c) slab order,
    # and zero-pad the 10 outputs to 128 lanes (sliced back in the wrapper).
    wfc_hwc = wfc.reshape(10, 32, 4, 4).transpose(2, 3, 1, 0).reshape(512, 10)
    wfc_pad = np.zeros((512, 128), np.float32)
    wfc_pad[:, :10] = wfc_hwc
    bfc_pad = np.zeros((1, 128), np.float32)
    bfc_pad[0, :10] = bfc
    return {
        "w1": jnp.asarray(_fold_conv_weight(w1, 28), jnp.bfloat16),   # (140, 384)
        "b1": jnp.asarray(np.tile(b1, 24)[None, :], jnp.float32),     # (1, 384)
        "w2": jnp.asarray(_fold_conv_weight(w2, 12), jnp.bfloat16),   # (960, 256)
        "b2": jnp.asarray(np.tile(b2, 8)[None, :], jnp.float32),      # (1, 256)
        "wfc": jnp.asarray(wfc_pad, jnp.bfloat16),                    # (512, 128)
        "bfc": jnp.asarray(bfc_pad, jnp.float32),                     # (1, 128)
    }


def init_raw_params(key):
    k1, k2, k3, k4, k5, k6 = jax.random.split(key, 6)
    s = 0.05
    return {
        "w1": s * jax.random.normal(k1, (16, 1, 5, 5), jnp.float32),
        "b1": s * jax.random.normal(k2, (16,), jnp.float32),
        "w2": s * jax.random.normal(k3, (32, 16, 5, 5), jnp.float32),
        "b2": s * jax.random.normal(k4, (32,), jnp.float32),
        "wfc": s * jax.random.normal(k5, (10, 32 * 4 * 4), jnp.float32),
        "bfc": s * jax.random.normal(k6, (10,), jnp.float32),
    }


def reference_forward(x_nchw, raw):
    """Pure-JAX f32 reference mirroring the PyTorch module."""
    dn = ("NCHW", "OIHW", "NCHW")
    y = lax.conv_general_dilated(x_nchw, raw["w1"], (1, 1), "VALID",
                                 dimension_numbers=dn)
    y = jax.nn.relu(y + raw["b1"][None, :, None, None])
    y = lax.reduce_window(y, -jnp.inf, lax.max, (1, 1, 2, 2), (1, 1, 2, 2), "VALID")
    y = lax.conv_general_dilated(y, raw["w2"], (1, 1), "VALID",
                                 dimension_numbers=dn)
    y = jax.nn.relu(y + raw["b2"][None, :, None, None])
    y = lax.reduce_window(y, -jnp.inf, lax.max, (1, 1, 2, 2), (1, 1, 2, 2), "VALID")
    y = y.reshape(y.shape[0], -1)
    return y @ raw["wfc"].T + raw["bfc"]


if __name__ == "__main__":
    key = jax.random.PRNGKey(0)
    kx, kp = jax.random.split(key)
    # 28x28 single-channel input is required by fc1 = Linear(32*4*4, 10).
    x = jax.random.normal(kx, (2, 1, 28, 28), jnp.float32)
    raw = init_raw_params(kp)
    params = prepare_params(raw)

    out = jax.jit(cnn_model_forward)(x, params)
    out = jax.block_until_ready(out)
    assert out.shape == (2, 10) and out.dtype == jnp.float32

    # Correctness check vs. f32 reference (loose tolerance for bf16 MXU inputs).
    ref = reference_forward(x, raw)
    assert jnp.allclose(out, ref, atol=5e-2, rtol=5e-2), \
        float(jnp.max(jnp.abs(out - ref)))

    print("KERNEL_OK")
</pallas_src>

<mosaic_0001>
module attributes {stable_mosaic.version = 11 : i64} {
  func.func @_cnn_fused_kernel(%arg0: i32, %arg1: memref<2x28x28xbf16, #tpu.memory_space<vmem>>, %arg2: memref<140x384xbf16, #tpu.memory_space<vmem>>, %arg3: memref<1x384xf32, #tpu.memory_space<vmem>>, %arg4: memref<960x256xbf16, #tpu.memory_space<vmem>>, %arg5: memref<1x256xf32, #tpu.memory_space<vmem>>, %arg6: memref<512x128xbf16, #tpu.memory_space<vmem>>, %arg7: memref<1x128xf32, #tpu.memory_space<vmem>>, %arg8: memref<2x128xf32, #tpu.memory_space<vmem>>) attributes {dimension_semantics = [#tpu.dimension_semantics<parallel>], iteration_bounds = array<i64: 1>, scalar_prefetch = 0 : i64, scratch_operands = 0 : i64, tpu.core_type = #tpu.core_type<tc>, window_params = [{transform_indices = @transform_0, window_bounds = array<i64: 2, 28, 28>}, {pipeline_mode = #tpu.pipeline_mode<synchronous>, transform_indices = @transform_1, window_bounds = array<i64: 140, 384>}, {pipeline_mode = #tpu.pipeline_mode<synchronous>, transform_indices = @transform_2, window_bounds = array<i64: 1, 384>}, {pipeline_mode = #tpu.pipeline_mode<synchronous>, transform_indices = @transform_3, window_bounds = array<i64: 960, 256>}, {pipeline_mode = #tpu.pipeline_mode<synchronous>, transform_indices = @transform_4, window_bounds = array<i64: 1, 256>}, {pipeline_mode = #tpu.pipeline_mode<synchronous>, transform_indices = @transform_5, window_bounds = array<i64: 512, 128>}, {pipeline_mode = #tpu.pipeline_mode<synchronous>, transform_indices = @transform_6, window_bounds = array<i64: 1, 128>}, {transform_indices = @transform_7, window_bounds = array<i64: 2, 128>}]} {
    %c0 = arith.constant 0 : index
    %c0_0 = arith.constant 0 : index
    %c0_1 = arith.constant 0 : index
    %0 = vector.load %arg1[%c0, %c0_0, %c0_1] : memref<2x28x28xbf16, #tpu.memory_space<vmem>>, vector<2x28x28xbf16>
    %1 = vector.extract_strided_slice %0 {offsets = [0, 0, 0], sizes = [2, 24, 28], strides = [1, 1, 1]} : vector<2x28x28xbf16> to vector<2x24x28xbf16>
    %2 = vector.extract_strided_slice %0 {offsets = [0, 1, 0], sizes = [2, 24, 28], strides = [1, 1, 1]} : vector<2x28x28xbf16> to vector<2x24x28xbf16>
    %3 = vector.extract_strided_slice %0 {offsets = [0, 2, 0], sizes = [2, 24, 28], strides = [1, 1, 1]} : vector<2x28x28xbf16> to vector<2x24x28xbf16>
    %4 = vector.extract_strided_slice %0 {offsets = [0, 3, 0], sizes = [2, 24, 28], strides = [1, 1, 1]} : vector<2x28x28xbf16> to vector<2x24x28xbf16>
    %5 = vector.extract_strided_slice %0 {offsets = [0, 4, 0], sizes = [2, 24, 28], strides = [1, 1, 1]} : vector<2x28x28xbf16> to vector<2x24x28xbf16>
    %6 = tpu.concatenate %1, %2, %3, %4, %5 in 2 : vector<2x24x28xbf16>, vector<2x24x28xbf16>, vector<2x24x28xbf16>, vector<2x24x28xbf16>, vector<2x24x28xbf16> -> vector<2x24x140xbf16>
    %7 = vector.shape_cast %6 : vector<2x24x140xbf16> to vector<48x140xbf16>
    %c0_2 = arith.constant 0 : index
    %c0_3 = arith.constant 0 : index
    %8 = vector.load %arg2[%c0_2, %c0_3] : memref<140x384xbf16, #tpu.memory_space<vmem>>, vector<140x384xbf16>
    %cst = arith.constant dense<0.000000e+00> : vector<48x384xf32>
    %9 = tpu.matmul %7, %8, %cst {dimension_numbers = #tpu.dot_dimension_numbers<[1], [0], [0], [1], [0, 0, 1, 1], [], []>} : vector<48x140xbf16>, vector<140x384xbf16>, vector<48x384xf32> -> vector<48x384xf32>
    %c0_4 = arith.constant 0 : index
    %c0_5 = arith.constant 0 : index
    %10 = vector.load %arg3[%c0_4, %c0_5] : memref<1x384xf32, #tpu.memory_space<vmem>>, vector<1x384xf32>
    %11 = vector.broadcast %10 : vector<1x384xf32> to vector<48x384xf32>
    %12 = arith.addf %9, %11 : vector<48x384xf32>
    %cst_6 = arith.constant 0.000000e+00 : f32
    %13 = vector.broadcast %cst_6 : f32 to vector<48x384xf32>
    %14 = arith.maximumf %12, %13 : vector<48x384xf32>
    %15 = arith.truncf %14 : vector<48x384xf32> to vector<48x384xbf16>
    %16 = vector.extract_strided_slice %15 {offsets = [0, 0], sizes = [48, 192], strides = [1, 1]} : vector<48x384xbf16> to vector<48x192xbf16>
    %17 = vector.extract_strided_slice %15 {offsets = [0, 192], sizes = [48, 192], strides = [1, 1]} : vector<48x384xbf16> to vector<48x192xbf16>
    %18 = arith.maximumf %16, %17 : vector<48x192xbf16>
    %19 = vector.shape_cast %18 : vector<48x192xbf16> to vector<24x2x192xbf16>
    %20 = vector.extract_strided_slice %19 {offsets = [0, 0, 0], sizes = [24, 1, 192], strides = [1, 1, 1]} : vector<24x2x192xbf16> to vector<24x1x192xbf16>
    %21 = vector.extract_strided_slice %19 {offsets = [0, 1, 0], sizes = [24, 1, 192], strides = [1, 1, 1]} : vector<24x2x192xbf16> to vector<24x1x192xbf16>
    %22 = arith.maximumf %20, %21 : vector<24x1x192xbf16>
    %23 = vector.shape_cast %22 : vector<24x1x192xbf16> to vector<2x12x192xbf16>
    %24 = vector.extract_strided_slice %23 {offsets = [0, 0, 0], sizes = [2, 8, 192], strides = [1, 1, 1]} : vector<2x12x192xbf16> to vector<2x8x192xbf16>
    %25 = vector.extract_strided_slice %23 {offsets = [0, 1, 0], sizes = [2, 8, 192], strides = [1, 1, 1]} : vector<2x12x192xbf16> to vector<2x8x192xbf16>
    %26 = vector.extract_strided_slice %23 {offsets = [0, 2, 0], sizes = [2, 8, 192], strides = [1, 1, 1]} : vector<2x12x192xbf16> to vector<2x8x192xbf16>
    %27 = vector.extract_strided_slice %23 {offsets = [0, 3, 0], sizes = [2, 8, 192], strides = [1, 1, 1]} : vector<2x12x192xbf16> to vector<2x8x192xbf16>
    %28 = vector.extract_strided_slice %23 {offsets = [0, 4, 0], sizes = [2, 8, 192], strides = [1, 1, 1]} : vector<2x12x192xbf16> to vector<2x8x192xbf16>
    %29 = tpu.concatenate %24, %25, %26, %27, %28 in 2 : vector<2x8x192xbf16>, vector<2x8x192xbf16>, vector<2x8x192xbf16>, vector<2x8x192xbf16>, vector<2x8x192xbf16> -> vector<2x8x960xbf16>
    %30 = vector.shape_cast %29 : vector<2x8x960xbf16> to vector<16x960xbf16>
    %c0_7 = arith.constant 0 : index
    %c0_8 = arith.constant 0 : index
    %31 = vector.load %arg4[%c0_7, %c0_8] : memref<960x256xbf16, #tpu.memory_space<vmem>>, vector<960x256xbf16>
    %cst_9 = arith.constant dense<0.000000e+00> : vector<16x256xf32>
    %32 = tpu.matmul %30, %31, %cst_9 {dimension_numbers = #tpu.dot_dimension_numbers<[1], [0], [0], [1], [0, 0, 1, 1], [], []>} : vector<16x960xbf16>, vector<960x256xbf16>, vector<16x256xf32> -> vector<16x256xf32>
    %c0_10 = arith.constant 0 : index
    %c0_11 = arith.constant 0 : index
    %33 = vector.load %arg5[%c0_10, %c0_11] : memref<1x256xf32, #tpu.memory_space<vmem>>, vector<1x256xf32>
    %34 = vector.broadcast %33 : vector<1x256xf32> to vector<16x256xf32>
    %35 = arith.addf %32, %34 : vector<16x256xf32>
    %cst_12 = arith.constant 0.000000e+00 : f32
    %36 = vector.broadcast %cst_12 : f32 to vector<16x256xf32>
    %37 = arith.maximumf %35, %36 : vector<16x256xf32>
    %38 = arith.truncf %37 : vector<16x256xf32> to vector<16x256xbf16>
    %39 = vector.extract_strided_slice %38 {offsets = [0, 0], sizes = [16, 128], strides = [1, 1]} : vector<16x256xbf16> to vector<16x128xbf16>
    %40 = vector.extract_strided_slice %38 {offsets = [0, 128], sizes = [16, 128], strides = [1, 1]} : vector<16x256xbf16> to vector<16x128xbf16>
    %41 = arith.maximumf %39, %40 : vector<16x128xbf16>
    %42 = vector.shape_cast %41 : vector<16x128xbf16> to vector<8x2x128xbf16>
    %43 = vector.extract_strided_slice %42 {offsets = [0, 0, 0], sizes = [8, 1, 128], strides = [1, 1, 1]} : vector<8x2x128xbf16> to vector<8x1x128xbf16>
    %44 = vector.extract_strided_slice %42 {offsets = [0, 1, 0], sizes = [8, 1, 128], strides = [1, 1, 1]} : vector<8x2x128xbf16> to vector<8x1x128xbf16>
    %45 = arith.maximumf %43, %44 : vector<8x1x128xbf16>
    %46 = vector.shape_cast %45 : vector<8x1x128xbf16> to vector<2x4x128xbf16>
    %47 = vector.extract_strided_slice %46 {offsets = [0, 0, 0], sizes = [2, 1, 128], strides = [1, 1, 1]} : vector<2x4x128xbf16> to vector<2x1x128xbf16>
    %48 = vector.extract_strided_slice %46 {offsets = [0, 1, 0], sizes = [2, 1, 128], strides = [1, 1, 1]} : vector<2x4x128xbf16> to vector<2x1x128xbf16>
    %49 = vector.extract_strided_slice %46 {offsets = [0, 2, 0], sizes = [2, 1, 128], strides = [1, 1, 1]} : vector<2x4x128xbf16> to vector<2x1x128xbf16>
    %50 = vector.extract_strided_slice %46 {offsets = [0, 3, 0], sizes = [2, 1, 128], strides = [1, 1, 1]} : vector<2x4x128xbf16> to vector<2x1x128xbf16>
    %51 = tpu.concatenate %47, %48, %49, %50 in 2 : vector<2x1x128xbf16>, vector<2x1x128xbf16>, vector<2x1x128xbf16>, vector<2x1x128xbf16> -> vector<2x1x512xbf16>
    %52 = vector.shape_cast %51 : vector<2x1x512xbf16> to vector<2x512xbf16>
    %c0_13 = arith.constant 0 : index
    %c0_14 = arith.constant 0 : index
    %53 = vector.load %arg6[%c0_13, %c0_14] : memref<512x128xbf16, #tpu.memory_space<vmem>>, vector<512x128xbf16>
    %cst_15 = arith.constant dense<0.000000e+00> : vector<2x128xf32>
    %54 = tpu.matmul %52, %53, %cst_15 {dimension_numbers = #tpu.dot_dimension_numbers<[1], [0], [0], [1], [0, 0, 1, 1], [], []>} : vector<2x512xbf16>, vector<512x128xbf16>, vector<2x128xf32> -> vector<2x128xf32>
    %c0_16 = arith.constant 0 : index
    %c0_17 = arith.constant 0 : index
    %55 = vector.load %arg7[%c0_16, %c0_17] : memref<1x128xf32, #tpu.memory_space<vmem>>, vector<1x128xf32>
    %56 = vector.broadcast %55 : vector<1x128xf32> to vector<2x128xf32>
    %57 = arith.addf %54, %56 : vector<2x128xf32>
    %c0_18 = arith.constant 0 : index
    %c0_19 = arith.constant 0 : index
    %58 = vector.load %arg8[%c0_18, %c0_19] : memref<2x128xf32, #tpu.memory_space<vmem>>, vector<2x128xf32>
    tpu.vector_store %arg8[%c0_18, %c0_19], %57 {strides = array<i32>} : memref<2x128xf32, #tpu.memory_space<vmem>>, vector<2x128xf32>,
    return
  }
  func.func @transform_0(%arg0: i32) -> (i32, i32, i32) {
    %c0_i32 = arith.constant 0 : i32
    %c0_i32_0 = arith.constant 0 : i32
    %c0_i32_1 = arith.constant 0 : i32
    return %arg0, %c0_i32, %c0_i32_0 : i32, i32, i32
  }
  func.func @transform_1(%arg0: i32) -> (i32, i32) {
    %c0_i32 = arith.constant 0 : i32
    %c0_i32_0 = arith.constant 0 : i32
    %c0_i32_1 = arith.constant 0 : i32
    return %c0_i32, %c0_i32_0 : i32, i32
  }
  func.func @transform_2(%arg0: i32) -> (i32, i32) {
    %c0_i32 = arith.constant 0 : i32
    %c0_i32_0 = arith.constant 0 : i32
    %c0_i32_1 = arith.constant 0 : i32
    return %c0_i32, %c0_i32_0 : i32, i32
  }
  func.func @transform_3(%arg0: i32) -> (i32, i32) {
    %c0_i32 = arith.constant 0 : i32
    %c0_i32_0 = arith.constant 0 : i32
    %c0_i32_1 = arith.constant 0 : i32
    return %c0_i32, %c0_i32_0 : i32, i32
  }
  func.func @transform_4(%arg0: i32) -> (i32, i32) {
    %c0_i32 = arith.constant 0 : i32
    %c0_i32_0 = arith.constant 0 : i32
    %c0_i32_1 = arith.constant 0 : i32
    return %c0_i32, %c0_i32_0 : i32, i32
  }
  func.func @transform_5(%arg0: i32) -> (i32, i32) {
    %c0_i32 = arith.constant 0 : i32
    %c0_i32_0 = arith.constant 0 : i32
    %c0_i32_1 = arith.constant 0 : i32
    return %c0_i32, %c0_i32_0 : i32, i32
  }
  func.func @transform_6(%arg0: i32) -> (i32, i32) {
    %c0_i32 = arith.constant 0 : i32
    %c0_i32_0 = arith.constant 0 : i32
    %c0_i32_1 = arith.constant 0 : i32
    return %c0_i32, %c0_i32_0 : i32, i32
  }
  func.func @transform_7(%arg0: i32) -> (i32, i32) {
    %c0_i32 = arith.constant 0 : i32
    %c0_i32_0 = arith.constant 0 : i32
    return %arg0, %c0_i32 : i32, i32
  }
}

</mosaic_0001>

<bundles_post_ra>
// kernel: cnn_model_forward.1
= control target key start
LH: loop header
LB: loop body
LE: loop exit
PB: predicated region body
PF: predicated region fallthrough
CT: control target
= control target key end

     0   :  { %12 = vsyncpa [#allocation3], 0  ;;  %s4998_s0 = inlined_call_operand.vmem [shape: bf16[2,28,28], index: 0, kind: input, shape index: {}]   ;;  %s4999_s1 = inlined_call_operand.hbm [shape: bf16[140,384], index: 1, kind: input, shape index: {}]   ;;  %s5000_s2 = inlined_call_operand.vmem [shape: f32[1,384], index: 2, kind: input, shape index: {}]   ;;  %s5001_s3 = inlined_call_operand.hbm [shape: bf16[960,256], index: 3, kind: input, shape index: {}]   ;;  %s5002_s4 = inlined_call_operand.vmem [shape: f32[1,256], index: 4, kind: input, shape index: {}]   ;;  %s5003_s5 = inlined_call_operand.hbm [shape: bf16[512,128], index: 5, kind: input, shape index: {}]   ;;  %s5004_s6 = inlined_call_operand.vmem [shape: f32[1,128], index: 6, kind: input, shape index: {}]   ;;  %s5005_s7 = inlined_call_operand.hbm [shape: f32[2,128], index: 7, kind: output, shape index: {}]  }
   0x1   :  { %13 = vsyncpa [#allocation6], 0 }
   0x2   :  { %14 = vsyncpa [#allocation4], 0  ;;  %s4032_s24 = smov [#allocation5]   ;;  %s3938_s28 = scalar_lea.hbm %s5001_s3, 15360 }
   0x3   :  { %s36_s25 = sshll.u32 %s4032_s24, 4  ;;  %p3939_p0 = scmp.ne.s32.totalorder %s5001_s3, %s3938_s28  ;;  %s37_s25 = int_to_ptr.vmem [resolvable:$true] %s36_s25 }
   0x4   :  { %p3942_p1 = scmp.lt.u32.totalorder %s3938_s28, %s5001_s3 }
   0x6   :  { %p3944_p2 = pnand %p3942_p1, %p3939_p0 }
   0x8   :  { %3947 = shalt.err (!%p3944_p2)
}
   0x9   :  { %s3948_s10 = scalar_lea.vmem %s37_s25, 15360  ;;  %p3953_p4 = scmp.lt.s32.totalorder %s37_s25, %s37_s25 }
   0xa   :  { %p3949_p3 = scmp.ne.s32.totalorder %s37_s25, %s3948_s10  ;;  %p3954_p5 = scmp.lt.s32.totalorder %s3948_s10, %s3948_s10 }
   0xc   :  { %p3955_p6 = por %p3954_p5, %p3953_p4 }
   0xe   :  { %p3956_p7 = pnand %p3955_p6, %p3949_p3 }
  0x10   :  { %3959 = shalt.err (!%p3956_p7)
}
  0x11   :  { %s4033_s11 = smov 128   ;;  %s4034_s12 = smov 8  }
  0x12   :  { %42 = dma.hbm_to_vmem [thread:$0]  %s5001_s3, 15360, %s37_s25, [#allocation6], %s4033_s11, %s4033_s11, %s4034_s12  }
  0x13   :  { %s4035_s15 = smov [#allocation2]   ;;  %s3960_s19 = scalar_lea.hbm %s4999_s1, 3456 }
  0x14   :  { %s22_s16 = sshll.u32 %s4035_s15, 4  ;;  %p3961_p8 = scmp.ne.s32.totalorder %s4999_s1, %s3960_s19  ;;  %s23_s16 = int_to_ptr.vmem [resolvable:$true] %s22_s16 }
  0x15   :  { %p3964_p9 = scmp.lt.u32.totalorder %s3960_s19, %s4999_s1 }
  0x17   :  { %p3966_p10 = pnand %p3964_p9, %p3961_p8 }
  0x19   :  { %3969 = shalt.err (!%p3966_p10)
}
  0x1a   :  { %s3970_s24 = scalar_lea.vmem %s23_s16, 3456  ;;  %p3975_p12 = scmp.lt.s32.totalorder %s23_s16, %s23_s16 }
  0x1b   :  { %p3971_p11 = scmp.ne.s32.totalorder %s23_s16, %s3970_s24  ;;  %p3976_p13 = scmp.lt.s32.totalorder %s3970_s24, %s3970_s24 }
  0x1d   :  { %p3977_p0 = por %p3976_p13, %p3975_p12 }
  0x1f   :  { %p3978_p1 = pnand %p3977_p0, %p3971_p11 }
  0x21   :  { %3981 = shalt.err (!%p3978_p1)
}
  0x22   :  { %s4036_s3 = smov 192   ;;  %s4037_s25 = smov 12  }
  0x23   :  { %28 = dma.hbm_to_vmem [thread:$0]  %s4999_s1, 3456, %s23_s16, [#allocation3], %s4036_s3, %s4036_s3, %s4037_s25  }
  0x24   :  { %s4038_s28 = smov [#allocation7]   ;;  %s3982_s9 = scalar_lea.hbm %s5003_s5, 4096 }
  0x25   :  { %s50_s29 = sshll.u32 %s4038_s28, 4  ;;  %p3983_p2 = scmp.ne.s32.totalorder %s5003_s5, %s3982_s9  ;;  %s51_s29 = int_to_ptr.vmem [resolvable:$true] %s50_s29 }
  0x26   :  { %p3986_p3 = scmp.lt.u32.totalorder %s3982_s9, %s5003_s5 }
  0x28   :  { %p3988_p4 = pnand %p3986_p3, %p3983_p2 }
  0x2a   :  { %3991 = shalt.err (!%p3988_p4)
}
  0x2b   :  { %s3992_s14 = scalar_lea.vmem %s51_s29, 4096  ;;  %p3997_p6 = scmp.lt.s32.totalorder %s51_s29, %s51_s29 }
  0x2c   :  { %p3993_p5 = scmp.ne.s32.totalorder %s51_s29, %s3992_s14  ;;  %p3998_p7 = scmp.lt.s32.totalorder %s3992_s14, %s3992_s14 }
  0x2e   :  { %p3999_p8 = por %p3998_p7, %p3997_p6 }
  0x30   :  { %p4000_p9 = pnand %p3999_p8, %p3993_p5 }
  0x32   :  { %4003 = shalt.err (!%p4000_p9)
}
  0x33   :  { %s4039_s1 = smov 64   ;;  %s4040_s15 = smov 4  }
  0x34   :  { %56 = dma.hbm_to_vmem [thread:$0]  %s5003_s5, 4096, %s51_s29, [#allocation6], %s4039_s1, %s4039_s1, %s4040_s15  }
  0x35   :  { %4026 = dma.done.wait [#allocation3], 3456  }
  0x36   :  { %4027 = vsyncadd [#allocation3], 4294963840 }
  0x37   :  { %4028 = dma.done.wait [#allocation6], 19456  }
  0x38   :  { %4029 = vsyncadd [#allocation6], 4294947840  ;;  %vm176_vm0 = vcmask 1045504   ;;  %vm153_vm1 = vsmask.f32 6400  ;;  %v4137_v2 = vld [vmem:[%s4998_s0] sm:$0xff]  }
  0x39   :  { %vm99_vm2 = vsmask.f32 7424  ;;  %v4129_v0 = vld [vmem:[%s4998_s0 + $0x8] sm:$0xf]  ;;  %v72_v1 = vld [vmem:[%s4998_s0 + $0xc] sm:$0x3] }
  0x3a   :  { %vm138_vm3 = vcmask 1046528   ;;  %v4140_v3 = vcombine.low %v4129_v0, %v72_v1  ;;  %v4145_v4 = vld [vmem:[%s4998_s0 + $0x18] sm:$0xf]  ;;  %v76_v5 = vld [vmem:[%s4998_s0 + $0x1c] sm:$0x3]  ;;  %v177_v6 = vrot.slane %v4137_v2, 2 }
  0x3b   :  { %v101_v7 = vshrl.u32 %v4137_v2, 16  ;;  %v103_v8 = vshll.u32 %v4137_v2, 16  ;;  %v4156_v9 = vld [vmem:[%s4998_s0 + $0x10] sm:$0xff]   ;;  %v4159_v10 = vcombine.low %v4145_v4, %v76_v5  ;;  %v139_v14 = vrot.slane %v4137_v2, 1  ;;  %v3690_v20 = vld [vmem:[#allocation2] ss:$12 sps:$4 sm:$0xff]  }
  0x3c   :  { %v178_v11 = vrot.slane %v4140_v3, 2  ;;  %v108_v12 = vshll.u32 %v4140_v3, 16  ;;  %v112_v13 = vshrl.u32 %v4140_v3, 16  ;;  %v3688_v15 = vld [vmem:[#allocation2 + $0x4] ss:$12 sps:$4 sm:$0xff]   ;;  %v142_v19 = vrot.slane %v4156_v9, 1 }
  0x3d   :  { %v154_v16 = vrot.slane %v101_v7, 1  ;;  %v155_v17 = vrot.slane %v103_v8, 2  ;;  %v105_v18 = vrot.slane %v103_v8, 1  ;;  %468 = vmatprep.subr.bf16.mxu1 %v3688_v15  ;;  %s4041_s0 = smov 112   ;;  %v143_v27 = vrot.slane %v4159_v10, 1  ;;  %s4042_s28 = smov 28  }
  0x3e   :  { %v179_v21 = vsel %vm176_vm0, %v177_v6, %v178_v11  ;;  %v157_v22 = vrot.slane %v112_v13, 1  ;;  %v158_v23 = vrot.slane %v108_v12, 2  ;;  %v110_v24 = vrot.slane %v108_v12, 1  ;;  %469 = vmatpush1.bf16.msra.mxu1 %v3690_v20  ;;  %v3691_v29 = vld [vmem:[#allocation2 + $0x1c] ss:$12 sps:$4 sm:$0xff]   ;;  %s4043_s29 = smov 84  }
  0x3f   :  { %183 = vrot.lane.b32.xlu1 %v179_v21, %s4041_s0  ;;  %v156_v25 = vor.u32 %v155_v17, %v154_v16  ;;  %v106_v26 = vor.u32 %v105_v18, %v101_v7  ;;  %v140_v28 = vrot.slane %v4140_v3, 1  ;;  %v3693_v30 = vld [vmem:[#allocation2 + $0x18] ss:$12 sps:$4 sm:$0xff]   ;;  %v116_v32 = vshrl.u32 %v4156_v9, 16  ;;  %v3694_v35 = vld [vmem:[#allocation2 + $0x34] ss:$12 sps:$4 sm:$0xff]   ;;  %470 = vmatprep.subr.bf16.mxu1 %v3691_v29 }
  0x40   :  { %v159_v31 = vor.u32 %v158_v23, %v157_v22  ;;  %v118_v33 = vshll.u32 %v4156_v9, 16  ;;  %v123_v34 = vshll.u32 %v4159_v10, 16  ;;  %v127_v39 = vshrl.u32 %v4159_v10, 16  ;;  %v3696_v44 = vld [vmem:[#allocation2 + $0x30] ss:$12 sps:$4 sm:$0xff]   ;;  %s4044_s30 = smov 56  }
  0x41   :  { %v111_v36 = vsel %vm99_vm2, %v106_v26, %v110_v24  ;;  %v144_v40 = vsel %vm138_vm3, %v142_v19, %v143_v27  ;;  %v141_v41 = vsel %vm138_vm3, %v139_v14, %v140_v28  ;;  %v161_v43 = vrot.slane %v116_v32, 1  ;;  %v3697_v45 = vld [vmem:[#allocation2 + $0x4c] ss:$12 sps:$4 sm:$0xff]   ;;  %v3699_v51 = vld [vmem:[#allocation2 + $0x48] ss:$12 sps:$4 sm:$0xff]   ;;  %s4047_s12 = smov [#allocation8]  }
  0x42   :  { %v160_v37 = vsel %vm153_vm1, %v156_v25, %v159_v31  ;;  %130 = vrot.lane.b32.xlu0 %v111_v36, %s4042_s28  ;;  %v120_v38 = vrot.slane %v118_v33, 1  ;;  %v125_v42 = vrot.slane %v123_v34, 1  ;;  %471 = vmatpush1.bf16.msra.mxu1 %v3693_v30  ;;  %v162_v47 = vrot.slane %v118_v33, 2  ;;  %v3700_v55 = vld [vmem:[#allocation2 + $0x64] ss:$12 sps:$4 sm:$0xff]   ;;  %s3366_s13 = sshll.u32 %s4047_s12, 4  ;;  %s3367_s13 = int_to_ptr.vmem [resolvable:$true] %s3366_s13 }
  0x43   :  { %168 = vrot.lane.b32.xlu1 %v160_v37, %s4043_s29  ;;  %v164_v48 = vrot.slane %v127_v39, 1  ;;  %v165_v49 = vrot.slane %v123_v34, 2  ;;  %472 = vmatprep.subr.bf16.mxu1 %v3694_v35  ;;  %v114_v50 = vor.u32 %v112_v13, %v110_v24  ;;  %v180_v56 = vrot.slane %v4156_v9, 2  ;;  %v3702_v57 = vld [vmem:[#allocation2 + $0x60] ss:$12 sps:$4 sm:$0xff]   ;;  %s4004_s14 = scalar_lea.vmem %s3367_s13, 32  ;;  %p4009_p11 = scmp.lt.s32.totalorder %s3367_s13, %s3367_s13 }
  0x44   :  { %v121_v46 = vor.u32 %v120_v38, %v116_v32  ;;  %v163_v53 = vor.u32 %v162_v47, %v161_v43  ;;  %v181_v59 = vrot.slane %v4159_v10, 2  ;;  %v3703_v60 = vld [vmem:[#allocation2 + $0x7c] ss:$12 sps:$4 sm:$0xff]   ;;  %v3705_v61 = vld [vmem:[#allocation2 + $0x78] ss:$12 sps:$4 sm:$0xff]   ;;  %v129_v7 = vor.u32 %v127_v39, %v125_v42  ;;  %p4005_p10 = scmp.ne.s32.totalorder %s3367_s13, %s4004_s14  ;;  %p4010_p12 = scmp.lt.s32.totalorder %s4004_s14, %s4004_s14 }
  0x45   :  { %v166_v54 = vor.u32 %v165_v49, %v164_v48  ;;  %v3706_v63 = vld [vmem:[#allocation2 + $0x94] ss:$12 sps:$4 sm:$0xff]   ;;  %v3708_v1 = vld [vmem:[#allocation2 + $0x90] ss:$12 sps:$4 sm:$0xff]   ;;  %v3709_v5 = vld [vmem:[#allocation2 + $0xac] ss:$12 sps:$4 sm:$0xff]  }
  0x46   :  { %145 = vrot.lane.b32.xlu0 %v141_v41, %s4044_s30  ;;  %473 = vmatpush1.bf16.msra.mxu1 %v3696_v44  ;;  %v126_v52 = vsel %vm99_vm2, %v121_v46, %v125_v42  ;;  %v182_v62 = vsel %vm176_vm0, %v180_v56, %v181_v59  ;;  %v3711_v6 = vld [vmem:[#allocation2 + $0xa8] ss:$12 sps:$4 sm:$0xff]   ;;  %v3712_v8 = vld [vmem:[#allocation2 + $0xc4] ss:$12 sps:$4 sm:$0x3f]   ;;  %v4045_v3 = vmov 0   ;;  %v3379_v41 = vcombine.low %v4145_v4, %v4145_v4  ;;  %p4011_p13 = por %p4010_p12, %p4009_p11 }
  0x47   :  { %149 = vrot.lane.b32.xlu1 %v144_v40, %s4044_s30  ;;  %474 = vmatprep.subr.bf16.mxu1 %v3697_v45  ;;  %v167_v58 = vsel %vm153_vm1, %v163_v53, %v166_v54  ;;  %v3714_v12 = vld [vmem:[#allocation2 + $0xc0] ss:$12 sps:$4 sm:$0x3f]   ;;  %vm448_vm4 = vcmask 97280   ;;  %vm191_vm5 = vcmask 228352   ;;  %vm202_vm6 = vcmask 457728  }
  0x48   :  { %v460_v13 = vsel %vm176_vm0, %v3714_v12, 0  ;;  %vm211_vm7 = vcmask 687104   ;;  %vm220_vm8 = vcmask 916480   ;;  %v3715_v19 = vld [vmem:[#allocation2 + $0x8] ss:$12 sps:$4 sm:$0xff]   ;;  %vm633_vm9 = vcmask 523264   ;;  %p4012_p0 = pnand %p4011_p13, %p4005_p10 }
  0x49   :  { %v3717_v24 = vld [vmem:[#allocation2 + $0x20] ss:$12 sps:$4 sm:$0xff]   ;;  %v3718_v26 = vld [vmem:[#allocation2 + $0x38] ss:$12 sps:$4 sm:$0xff]   ;;  %v3720_v40 = vld [vmem:[#allocation2 + $0x68] ss:$12 sps:$4 sm:$0xff]  }
  0x4a   :  { %132 = vrot.lane.b32.xlu0 %v114_v50, %s4042_s28  ;;  %475 = vmatpush1.bf16.msra.mxu1 %v3699_v51  ;;  %v3722_v46 = vld [vmem:[#allocation2 + $0x80] ss:$12 sps:$4 sm:$0xff]   ;;  %vm1398_vm10 = vcmask 1041409   ;;  %vm1401_vm11 = vcmask 1042434   ;;  %vm1404_vm12 = vcmask 1043459   ;;  %vm1407_vm13 = vcmask 1044484  }
  0x4b   :  { %134 = vrot.lane.b32.xlu1 %v126_v52, %s4042_s28  ;;  %476 = vmatprep.subr.bf16.mxu1 %v3700_v55  ;;  %v3723_v52 = vld [vmem:[#allocation2 + $0x98] ss:$12 sps:$4 sm:$0xff]   ;;  %vm1410_vm14 = vcmask 1045509   ;;  %vm1413_vm15 = vcmask 1046534  }
  0x4e   :  { %147 = vrot.lane.b32.xlu0 %v140_v28, %s4044_s30  ;;  %477 = vmatpush1.bf16.msra.mxu1 %v3702_v57  ;;  %v3724_v57 = vld [vmem:[#allocation2 + $0xb0] ss:$12 sps:$4 sm:$0xff]  }
  0x4f   :  { %172 = vrot.lane.b32.xlu1 %v167_v58, %s4043_s29  ;;  %478 = vmatprep.subr.bf16.mxu1 %v3703_v60  ;;  %v3725_v58 = vld [vmem:[#allocation2 + $0xc8] ss:$12 sps:$4 sm:$0x3f]   ;;  %v283_v60 = vlaneseq }
  0x52   :  { %170 = vrot.lane.b32.xlu0 %v159_v31, %s4043_s29  ;;  %479 = vmatpush1.bf16.msra.mxu1 %v3705_v61  ;;  %v3719_v31 = vld [vmem:[#allocation2 + $0x50] ss:$12 sps:$4 sm:$0xff]   ;;  %v4255_v61 = vshrl.u32 %v283_v60, 7 }
  0x53   :  { %187 = vrot.lane.b32.xlu1 %v182_v62, %s4041_s0  ;;  %480 = vmatprep.subr.bf16.mxu1 %v3706_v63  ;;  %v281_v63 = vld [vmem:[%s5000_s2] sm:$0x7] }
  0x54   :  { %v5007_v62 = vsub.s32 0, %v4255_v61 }
  0x56   :  { %185 = vrot.lane.b32.xlu0 %v178_v11, %s4041_s0  ;;  %481 = vmatpush1.bf16.msra.mxu1 %v3708_v1  ;;  %v5006_v1 = vsub.s32 1, %v4255_v61 }
  0x57   :  { %151 = vrot.lane.b32.xlu1 %v143_v27, %s4044_s30  ;;  %482 = vmatprep.subr.bf16.mxu1 %v3709_v5  ;;  %v3377_v27 = vcombine.low %v4129_v0, %v4129_v0  ;;  %v286_v5 = vrot.slane %v281_v63, %v5007_v62  ;;  %v3801_v62 = vld [vmem:[#allocation5 + $0x1c4] ss:$8 sps:$4 sm:$0xff]  }
  0x5a   :  { %136 = vrot.lane.b32.xlu0 %v129_v7, %s4042_s28  ;;  %483 = vmatpush1.bf16.msra.mxu1 %v3711_v6  ;;  %v290_v6 = vrot.slane %v281_v63, %v5006_v1  ;;  %v3800_v1 = vld [vmem:[#allocation5 + $0xc4] ss:$8 sps:$4 sm:$0xff]  }
  0x5b   :  { %189 = vrot.lane.b32.xlu1 %v181_v59, %s4041_s0  ;;  %3411 = vmatprep.subr.msk.bf16.mxu1 %vm176_vm0, %v3712_v8  ;;  %v466_v59 = vsel %vm176_vm0, %v3725_v58, 0  ;;  %vm1416_vm0 = vcmask 1047559  }
  0x5e   :  { %174 = vrot.lane.b32.xlu0 %v166_v54, %s4043_s29  ;;  %485 = vmatpush1.bf16.msra.mxu1 %v460_v13 }
  0x5f   :  { %531 = vmatprep.subr.bf16.mxu1 %v4045_v3 }
  0xb1   :  { %v4209_v10 = vpop.permute.xlu1 %183 }
  0xb2   :  { %3412 = vmatprep.mubr.msk.bf16.mxu1 %vm448_vm4, %v4209_v10 }
  0xb4   :  { %v131_v11 = vpop.permute.xlu0 %130 }
  0xb5   :  { %v169_v14 = vpop.permute.xlu1 %168  ;;  %v193_v15 = vsel %vm191_vm5, %v4137_v2, %v131_v11 }
  0xb8   :  { %v146_v16 = vpop.permute.xlu0 %145 }
  0xb9   :  { %v150_v17 = vpop.permute.xlu1 %149  ;;  %v204_v18 = vsel %vm202_vm6, %v193_v15, %v146_v16 }
  0xba   :  { %v213_v20 = vsel %vm211_vm7, %v204_v18, %v169_v14 }
  0xbb   :  { %v4219_v21 = vsel %vm220_vm8, %v213_v20, %v4209_v10 }
  0xbc   :  { %501 = vmatmul.mubr.bf16.vlgmr.msra.gmra.mrb[0].mxu1 %v4219_v21  ;;  %v133_v22 = vpop.permute.xlu0 %132 }
  0xbd   :  { %v135_v23 = vpop.permute.xlu1 %134  ;;  %532 = vmatpush1.bf16.msra.mxu1 %v3715_v19  ;;  %v196_v32 = vsel %vm191_vm5, %v3377_v27, %v133_v22 }
  0xbe   :  { %533 = vmatprep.subr.bf16.mxu1 %v4045_v3  ;;  %v198_v28 = vsel %vm191_vm5, %v4156_v9, %v135_v23 }
  0xbf   :  { %v208_v33 = vsel %vm202_vm6, %v198_v28, %v150_v17 }
  0xc0   :  { %v148_v2 = vpop.permute.xlu0 %147 }
  0xc1   :  { %v173_v25 = vpop.permute.xlu1 %172  ;;  %534 = vmatpush1.bf16.msra.mxu1 %v3717_v24  ;;  %v206_v34 = vsel %vm202_vm6, %v196_v32, %v148_v2 }
  0xc2   :  { %535 = vmatprep.subr.bf16.mxu1 %v4045_v3  ;;  %v217_v35 = vsel %vm211_vm7, %v208_v33, %v173_v25 }
  0xc4   :  { %v171_v29 = vpop.permute.xlu0 %170 }
  0xc5   :  { %v188_v30 = vpop.permute.xlu1 %187  ;;  %536 = vmatpush1.bf16.msra.mxu1 %v3718_v26  ;;  %v215_v0 = vsel %vm211_vm7, %v206_v34, %v171_v29 }
  0xc6   :  { %537 = vmatprep.subr.bf16.mxu1 %v4045_v3  ;;  %v226_v37 = vsel %vm220_vm8, %v217_v35, %v188_v30  ;;  %v242_v47 = vunpack.c.h.b16 %v188_v30 }
  0xc7   :  { %v241_v54 = vunpack.c.h.b16 %v226_v37 }
  0xc8   :  { %v186_v36 = vpop.permute.xlu0 %185 }
  0xc9   :  { %v152_v9 = vpop.permute.xlu1 %151  ;;  %538 = vmatpush1.bf16.msra.mxu1 %v3719_v31  ;;  %v224_v38 = vsel %vm220_vm8, %v215_v0, %v186_v36  ;;  %v3383_v39 = vcombine.low %v186_v36, %v188_v30 }
  0xca   :  { %v3382_v42 = vcombine.low %v224_v38, %v226_v37  ;;  %539 = vmatprep.subr.bf16.mxu1 %v4045_v3 }
  0xcb   :  { %3413 = vmatprep.mubr.msk.bf16.mxu1 %vm448_vm4, %v3383_v39 }
  0xcc   :  { %511 = vmatmul.mubr.bf16.gmra.mrb[4].mxu1 %v3382_v42  ;;  %v137_v43 = vpop.permute.xlu0 %136 }
  0xcd   :  { %v190_v44 = vpop.permute.xlu1 %189  ;;  %540 = vmatpush1.bf16.msra.mxu1 %v3720_v40  ;;  %v201_v45 = vsel %vm191_vm5, %v3379_v41, %v137_v43 }
  0xce   :  { %v244_v48 = vunpack.c.l.b16 %v190_v44  ;;  %541 = vmatprep.subr.bf16.mxu1 %v4045_v3  ;;  %v210_v50 = vsel %vm202_vm6, %v201_v45, %v152_v9  ;;  %v293_v9 = vsub.s32 2, %v4255_v61 }
  0xd0   :  { %v303_v49 = vpack.c.b16 %v244_v48, %v242_v47  ;;  %v175_v4 = vpop.permute.xlu0 %174  ;;  %v294_v45 = vrot.slane %v281_v63, %v293_v9  ;;  %v3753_v9 = vld [vmem:[#allocation5 + $0x144] ss:$8 sps:$4 sm:$0xff]  }
  0xd1   :  { %542 = vmatpush1.bf16.msra.mxu1 %v3722_v46  ;;  %v219_v51 = vsel %vm211_vm7, %v210_v50, %v175_v4 }
  0xd2   :  { %v228_v53 = vsel %vm220_vm8, %v219_v51, %v190_v44  ;;  %3414 = vmatprep.mubr.msk.bf16.mxu1 %vm448_vm4, %v303_v49  ;;  %543 = vmatprep.subr.bf16.mxu1 %v4045_v3 }
  0xd3   :  { %v243_v55 = vunpack.c.l.b16 %v228_v53 }
  0xd5   :  { %544 = vmatpush1.bf16.msra.mxu1 %v3723_v52  ;;  %v302_v56 = vpack.c.b16 %v243_v55, %v241_v54 }
  0xd6   :  { %545 = vmatprep.subr.bf16.mxu1 %v4045_v3 }
  0xd7   :  { %521 = vmatmul.mubr.bf16.gmra.mrb[8].mxu1 %v302_v56 }
  0xd8   :  { %3415 = vmatprep.mubr.msk.bf16.mxu1 %vm448_vm4, %v4209_v10 }
  0xd9   :  { %546 = vmatpush1.bf16.msra.mxu1 %v3724_v57 }
  0xda   :  { %547 = vmatprep.subr.bf16.mxu1 %v4045_v3 }
  0xdd   :  { %548 = vmatpush1.bf16.msra.mxu1 %v466_v59 }
  0xe0   :  { %564 = vmatmul.mubr.bf16.vlgmr.msra.gmra.mrb[12].mxu1 %v4219_v21 }
  0xe1   :  { %3416 = vmatprep.mubr.msk.bf16.mxu1 %vm448_vm4, %v3383_v39 }
  0xe8   :  { %572 = vmatmul.mubr.bf16.gmra.mrb[16].mxu1 %v3382_v42 }
  0xe9   :  { %3417 = vmatprep.mubr.msk.bf16.mxu1 %vm448_vm4, %v303_v49 }
  0xf0   :  { %580 = vmatmul.mubr.bf16.gmra.mrb[20].mxu1 %v302_v56 }
 0x18f   :  { %v502_v7 = vpop.f32.mrb[0].mxu1 }
 0x190   :  { %v503_v8 = vadd.f32 %v502_v7, %v286_v5  ;;  %v504_v12 = vpop.f32.mrb[1].mxu1 }
 0x191   :  { %v505_v13 = vadd.f32 %v504_v12, %v290_v6  ;;  %v506_v3 = vpop.f32.mrb[2].mxu1 }
 0x192   :  { %v507_v10 = vadd.f32 %v506_v3, %v286_v5  ;;  %v508_v11 = vpop.f32.mrb[3].mxu1  ;;  %v588_v15 = vmax.f32 %v503_v8, 0.0 }
 0x193   :  { %v509_v14 = vadd.f32 %v508_v11, %v290_v6  ;;  %v589_v17 = vmax.f32 %v505_v13, 0.0 }
 0x194   :  { %v591_v16 = vmax.f32 %v507_v10, 0.0 }
 0x195   :  { %v592_v18 = vmax.f32 %v509_v14, 0.0 }
 0x196   :  { %v4266_v19 = vpack.c.bf16 %v591_v16, %v588_v15 }
 0x197   :  { %v4268_v20 = vpack.c.bf16 %v592_v18, %v589_v17  ;;  %v3726_v17 = vld [vmem:[#allocation5] ss:$8 sps:$4 sm:$0xff]   ;;  %v3728_v18 = vld [vmem:[#allocation5 + $0x4] ss:$8 sps:$4 sm:$0xff]  }
 0x198   :  { %2691 = vmatprep.subr.bf16.mxu1 %v3728_v18 }
 0x199   :  { %621 = vrot.lane.b32.xlu0 %v4268_v20, %s4039_s1  ;;  %2692 = vmatpush1.bf16.msra.mxu1 %v3726_v17 }
 0x19f   :  { %v512_v21 = vpop.f32.mrb[4].mxu1 }
 0x1a0   :  { %v513_v22 = vadd.f32 %v512_v21, %v286_v5  ;;  %v514_v23 = vpop.f32.mrb[5].mxu1  ;;  %v3729_v21 = vld [vmem:[#allocation5 + $0x104] ss:$8 sps:$4 sm:$0xff]  }
 0x1a1   :  { %v515_v24 = vadd.f32 %v514_v23, %v290_v6  ;;  %v516_v2 = vpop.f32.mrb[6].mxu1  ;;  %v3734_v23 = vld [vmem:[#allocation5 + $0x14] ss:$8 sps:$4 sm:$0xff]   ;;  %2734 = vmatprep.subr.bf16.mxu0 %v3729_v21 }
 0x1a2   :  { %v517_v25 = vadd.f32 %v516_v2, %v286_v5  ;;  %v518_v26 = vpop.f32.mrb[7].mxu1  ;;  %v594_v28 = vmax.f32 %v513_v22, 0.0  ;;  %v3731_v22 = vld [vmem:[#allocation5 + $0x100] ss:$8 sps:$4 sm:$0xff]   ;;  %v3732_v2 = vld [vmem:[#allocation5 + $0x10] ss:$8 sps:$4 sm:$0xff]   ;;  %2693 = vmatprep.subr.bf16.mxu1 %v3734_v23 }
 0x1a3   :  { %v519_v27 = vadd.f32 %v518_v26, %v290_v6  ;;  %v595_v30 = vmax.f32 %v515_v24, 0.0  ;;  %v3735_v24 = vld [vmem:[#allocation5 + $0x114] ss:$8 sps:$4 sm:$0xff]   ;;  %2735 = vmatpush1.bf16.msra.mxu0 %v3731_v22  ;;  %v3740_v26 = vld [vmem:[#allocation5 + $0x24] ss:$8 sps:$4 sm:$0xff]   ;;  %2694 = vmatpush1.bf16.msra.mxu1 %v3732_v2 }
 0x1a4   :  { %v597_v29 = vmax.f32 %v517_v25, 0.0  ;;  %v3737_v25 = vld [vmem:[#allocation5 + $0x110] ss:$8 sps:$4 sm:$0xff]   ;;  %2736 = vmatprep.subr.bf16.mxu0 %v3735_v24  ;;  %2695 = vmatprep.subr.bf16.mxu1 %v3740_v26  ;;  %v3774_v26 = vld [vmem:[#allocation5 + $0x80] ss:$8 sps:$4 sm:$0xff]  }
 0x1a5   :  { %v598_v31 = vmax.f32 %v519_v27, 0.0  ;;  %v3741_v27 = vld [vmem:[#allocation5 + $0x124] ss:$8 sps:$4 sm:$0xff]  }
 0x1a6   :  { %v4272_v32 = vpack.c.bf16 %v597_v29, %v594_v28  ;;  %v3738_v28 = vld [vmem:[#allocation5 + $0x20] ss:$8 sps:$4 sm:$0xff]  }
 0x1a7   :  { %v4274_v33 = vpack.c.bf16 %v598_v31, %v595_v30  ;;  %2737 = vmatpush1.bf16.msra.mxu0 %v3737_v25  ;;  %v3743_v29 = vld [vmem:[#allocation5 + $0x120] ss:$8 sps:$4 sm:$0xff]   ;;  %v3746_v30 = vld [vmem:[#allocation5 + $0x34] ss:$8 sps:$4 sm:$0xff]   ;;  %2696 = vmatpush1.bf16.msra.mxu1 %v3738_v28 }
 0x1a8   :  { %2738 = vmatprep.subr.bf16.mxu0 %v3741_v27  ;;  %v3747_v31 = vld [vmem:[#allocation5 + $0x134] ss:$8 sps:$4 sm:$0xff]   ;;  %2697 = vmatprep.subr.bf16.mxu1 %v3746_v30 }
 0x1a9   :  { %625 = vrot.lane.b32.xlu0 %v4274_v33, %s4039_s1 }
 0x1aa   :  { %v522_v34 = vpop.f32.mrb[8].mxu1 }
 0x1ab   :  { %v523_v35 = vadd.f32 %v522_v34, %v286_v5  ;;  %v524_v0 = vpop.f32.mrb[9].mxu1  ;;  %2739 = vmatpush1.bf16.msra.mxu0 %v3743_v29  ;;  %v3744_v34 = vld [vmem:[#allocation5 + $0x30] ss:$8 sps:$4 sm:$0xff]  }
 0x1ac   :  { %v525_v36 = vadd.f32 %v524_v0, %v290_v6  ;;  %v526_v37 = vpop.f32.mrb[10].mxu1  ;;  %v4046_v0 = vmov 1966171168   ;;  %2740 = vmatprep.subr.bf16.mxu0 %v3747_v31  ;;  %2698 = vmatpush1.bf16.msra.mxu1 %v3744_v34  ;;  %v3779_v34 = vld [vmem:[#allocation5 + $0x180] ss:$8 sps:$4 sm:$0xff]  }
 0x1ad   :  { %v527_v38 = vadd.f32 %v526_v37, %v286_v5  ;;  %v528_v39 = vpop.f32.mrb[11].mxu1  ;;  %v600_v41 = vmax.f32 %v523_v35, 0.0  ;;  %v3749_v35 = vld [vmem:[#allocation5 + $0x130] ss:$8 sps:$4 sm:$0xff]   ;;  %v3752_v37 = vld [vmem:[#allocation5 + $0x44] ss:$8 sps:$4 sm:$0xff]  }
 0x1ae   :  { %v529_v40 = vadd.f32 %v528_v39, %v290_v6  ;;  %v601_v43 = vmax.f32 %v525_v36, 0.0  ;;  %v658_v36 = vunpack.c.l.s4 %v4046_v0  ;;  %v3755_v39 = vld [vmem:[#allocation5 + $0x140] ss:$8 sps:$4 sm:$0xff]   ;;  %2699 = vmatprep.subr.bf16.mxu1 %v3752_v37  ;;  %v3782_v37 = vld [vmem:[#allocation5 + $0x94] ss:$8 sps:$4 sm:$0xff]  }
 0x1af   :  { %v603_v42 = vmax.f32 %v527_v38, 0.0  ;;  %2741 = vmatpush1.bf16.msra.mxu0 %v3749_v35  ;;  %v3750_v38 = vld [vmem:[#allocation5 + $0x40] ss:$8 sps:$4 sm:$0xff]  }
 0x1b0   :  { %v604_v44 = vmax.f32 %v529_v40, 0.0  ;;  %v659_v40 = vunpack.c.0.s8 %v658_v36  ;;  %2742 = vmatprep.subr.bf16.mxu0 %v3753_v9  ;;  %2700 = vmatpush1.bf16.msra.mxu1 %v3750_v38 }
 0x1b1   :  { %v4279_v46 = vpack.c.bf16 %v603_v42, %v600_v41  ;;  %v3758_v41 = vld [vmem:[#allocation5 + $0x54] ss:$8 sps:$4 sm:$0xff]  }
 0x1b2   :  { %v4281_v47 = vpack.c.bf16 %v604_v44, %v601_v43  ;;  %v3759_v42 = vld [vmem:[#allocation5 + $0x154] ss:$8 sps:$4 sm:$0xff]   ;;  %2701 = vmatprep.subr.bf16.mxu1 %v3758_v41 }
 0x1b3   :  { %v565_v48 = vpop.f32.mrb[12].mxu1  ;;  %2743 = vmatpush1.bf16.msra.mxu0 %v3755_v39 }
 0x1b4   :  { %v566_v49 = vadd.f32 %v565_v48, %v294_v45  ;;  %v567_v50 = vpop.f32.mrb[13].mxu1  ;;  %629 = vrot.lane.b32.xlu0 %v4281_v47, %s4039_s1  ;;  %2744 = vmatprep.subr.bf16.mxu0 %v3759_v42  ;;  %v3783_v42 = vld [vmem:[#allocation5 + $0x194] ss:$8 sps:$4 sm:$0xff]  }
 0x1b5   :  { %v568_v4 = vpop.f32.mrb[14].mxu1  ;;  %v3761_v50 = vld [vmem:[#allocation5 + $0x150] ss:$8 sps:$4 sm:$0xff]  }
 0x1b6   :  { %v569_v51 = vadd.f32 %v568_v4, %v294_v45  ;;  %v570_v52 = vpop.f32.mrb[15].mxu1  ;;  %v590_v53 = vmax.f32 %v566_v49, 0.0  ;;  %v3756_v49 = vld [vmem:[#allocation5 + $0x50] ss:$8 sps:$4 sm:$0xff]   ;;  %v4291_v4 = vsub.s32 %v659_v40, %v4255_v61 }
 0x1b7   :  { %v3764_v52 = vld [vmem:[#allocation5 + $0x64] ss:$8 sps:$4 sm:$0xff]   ;;  %2702 = vmatpush1.bf16.msra.mxu1 %v3756_v49  ;;  %2745 = vmatpush1.bf16.msra.mxu0 %v3761_v50 }
 0x1b8   :  { %v593_v54 = vmax.f32 %v569_v51, 0.0  ;;  %2703 = vmatprep.subr.bf16.mxu1 %v3764_v52 }
 0x1ba   :  { %v608_v55 = vpack.c.bf16 %v593_v54, %v590_v53  ;;  %v3765_v53 = vld [vmem:[#allocation5 + $0x164] ss:$8 sps:$4 sm:$0xff]  }
 0x1bb   :  { %v573_v56 = vpop.f32.mrb[16].mxu1  ;;  %2746 = vmatprep.subr.bf16.mxu0 %v3765_v53 }
 0x1bc   :  { %v574_v57 = vadd.f32 %v573_v56, %v294_v45  ;;  %v575_v58 = vpop.f32.mrb[17].mxu1  ;;  %623 = vrot.lane.b32.xlu1 %v608_v55, %s4039_s1  ;;  %v3762_v56 = vld [vmem:[#allocation5 + $0x60] ss:$8 sps:$4 sm:$0xff]  }
 0x1bd   :  { %v576_v59 = vpop.f32.mrb[18].mxu1  ;;  %2704 = vmatpush1.bf16.msra.mxu1 %v3762_v56  ;;  %v3788_v56 = vld [vmem:[#allocation5 + $0xa4] ss:$8 sps:$4 sm:$0xff]  }
 0x1be   :  { %v577_v60 = vadd.f32 %v576_v59, %v294_v45  ;;  %v578_v63 = vpop.f32.mrb[19].mxu1  ;;  %v596_v5 = vmax.f32 %v574_v57, 0.0  ;;  %v3767_v57 = vld [vmem:[#allocation5 + $0x160] ss:$8 sps:$4 sm:$0xff]   ;;  %v3770_v59 = vld [vmem:[#allocation5 + $0x74] ss:$8 sps:$4 sm:$0xff]  }
 0x1bf   :  { %2747 = vmatpush1.bf16.msra.mxu0 %v3767_v57  ;;  %2705 = vmatprep.subr.bf16.mxu1 %v3770_v59  ;;  %v3789_v57 = vld [vmem:[#allocation5 + $0x1a4] ss:$8 sps:$4 sm:$0xff]  }
 0x1c0   :  { %v599_v6 = vmax.f32 %v577_v60, 0.0  ;;  %v3771_v60 = vld [vmem:[#allocation5 + $0x174] ss:$8 sps:$4 sm:$0xff]  }
 0x1c1   :  { %2748 = vmatprep.subr.bf16.mxu0 %v3771_v60 }
 0x1c2   :  { %v611_v7 = vpack.c.bf16 %v599_v6, %v596_v5 }
 0x1c3   :  { %v581_v8 = vpop.f32.mrb[20].mxu1 }
 0x1c4   :  { %v582_v12 = vadd.f32 %v581_v8, %v294_v45  ;;  %v583_v13 = vpop.f32.mrb[21].mxu1  ;;  %627 = vrot.lane.b32.xlu1 %v611_v7, %s4039_s1  ;;  %v3768_v7 = vld [vmem:[#allocation5 + $0x70] ss:$8 sps:$4 sm:$0xff]  }
 0x1c5   :  { %v584_v3 = vpop.f32.mrb[22].mxu1  ;;  %v3773_v8 = vld [vmem:[#allocation5 + $0x170] ss:$8 sps:$4 sm:$0xff]   ;;  %2706 = vmatpush1.bf16.msra.mxu1 %v3768_v7 }
 0x1c6   :  { %v585_v10 = vadd.f32 %v584_v3, %v294_v45  ;;  %v586_v11 = vpop.f32.mrb[23].mxu1  ;;  %v602_v14 = vmax.f32 %v582_v12, 0.0  ;;  %2749 = vmatpush1.bf16.msra.mxu0 %v3773_v8 }
 0x1c7   :  { %v3776_v11 = vld [vmem:[#allocation5 + $0x84] ss:$8 sps:$4 sm:$0xff]  }
 0x1c8   :  { %v605_v15 = vmax.f32 %v585_v10, 0.0  ;;  %2707 = vmatprep.subr.bf16.mxu1 %v3776_v11 }
 0x1c9   :  { %2708 = vmatpush1.bf16.msra.mxu1 %v3774_v26 }
 0x1ca   :  { %v614_v16 = vpack.c.bf16 %v605_v15, %v602_v14  ;;  %v3777_v14 = vld [vmem:[#allocation5 + $0x184] ss:$8 sps:$4 sm:$0xff]   ;;  %2709 = vmatprep.subr.bf16.mxu1 %v3782_v37 }
 0x1cb   :  { %2750 = vmatprep.subr.bf16.mxu0 %v3777_v14 }
 0x1cc   :  { %631 = vrot.lane.b32.xlu1 %v614_v16, %s4039_s1  ;;  %2751 = vmatpush1.bf16.msra.mxu0 %v3779_v34  ;;  %v3797_v34 = vld [vmem:[#allocation5 + $0x1b0] ss:$8 sps:$4 sm:$0xff]  }
 0x1cd   :  { %2752 = vmatprep.subr.bf16.mxu0 %v3783_v42 }
 0x20b   :  { %v622_v43 = vpop.permute.xlu0 %621 }
 0x21b   :  { %v626_v9 = vpop.permute.xlu0 %625 }
 0x22e   :  { %v624_v44 = vpop.permute.xlu1 %623 }
 0x22f   :  { %v634_v45 = vsel %vm633_vm9, %v622_v43, %v624_v44  ;;  %v644_v48 = vmax.bf16 %v624_v44, %v4268_v20 }
 0x230   :  { %v643_v51 = vmax.bf16 %v634_v45, %v4266_v19 }
 0x232   :  { %v655_v54 = vcombine.low %v643_v51, %v644_v48  ;;  %v656_v55 = vcombine.high %v643_v51, %v644_v48  ;;  %v3780_v48 = vld [vmem:[#allocation5 + $0x90] ss:$8 sps:$4 sm:$0xff]  }
 0x233   :  { %v3785_v51 = vld [vmem:[#allocation5 + $0x190] ss:$8 sps:$4 sm:$0xff]   ;;  %2710 = vmatpush1.bf16.msra.mxu1 %v3780_v48 }
 0x234   :  { %v663_v20 = vrot.slane %v655_v54, %v4291_v4  ;;  %v670_v58 = vrot.slane %v656_v55, %v4291_v4  ;;  %2753 = vmatpush1.bf16.msra.mxu0 %v3785_v51  ;;  %2711 = vmatprep.subr.bf16.mxu1 %v3788_v56 }
 0x235   :  { %2754 = vmatprep.subr.bf16.mxu0 %v3789_v57 }
 0x236   :  { %v671_v63 = vcombine.high %v663_v20, %v663_v20  ;;  %v672_v19 = vcombine.high %v670_v58, %v670_v58  ;;  %v679_v5 = vrot.slane %v663_v20, %v4291_v4  ;;  %v686_v6 = vrot.slane %v670_v58, %v4291_v4  ;;  %v628_v31 = vpop.permute.xlu1 %627 }
 0x237   :  { %v635_v45 = vsel %vm633_vm9, %v626_v9, %v628_v31  ;;  %v4310_v50 = vmax.bf16 %v628_v31, %v4274_v33 }
 0x238   :  { %v693_v12 = vrot.slane %v671_v63, %v4291_v4  ;;  %v700_v13 = vrot.slane %v672_v19, %v4291_v4  ;;  %v701_v3 = vcombine.high %v679_v5, %v679_v5  ;;  %v702_v10 = vcombine.high %v686_v6, %v686_v6 }
 0x239   :  { %v830_v15 = vshrl.u32 %v679_v5, 16  ;;  %v850_v16 = vshrl.u32 %v686_v6, 16  ;;  %v645_v59 = vmax.bf16 %v635_v45, %v4272_v32 }
 0x23a   :  { %v703_v17 = vcombine.high %v693_v12, %v693_v12  ;;  %v704_v18 = vcombine.high %v700_v13, %v700_v13  ;;  %v835_v21 = vshrl.u32 %v693_v12, 16  ;;  %v840_v22 = vshrl.u32 %v701_v3, 16 }
 0x23b   :  { %v855_v23 = vshrl.u32 %v700_v13, 16  ;;  %v860_v24 = vshrl.u32 %v702_v10, 16  ;;  %v973_v2 = vmax.bf16 %v830_v15, %v679_v5  ;;  %v977_v25 = vmax.bf16 %v850_v16, %v686_v6  ;;  %v3786_v6 = vld [vmem:[#allocation5 + $0xa0] ss:$8 sps:$4 sm:$0xff]   ;;  %v3795_v16 = vld [vmem:[#allocation5 + $0x1b4] ss:$8 sps:$4 sm:$0xff]  }
 0x23c   :  { %v845_v27 = vshrl.u32 %v703_v17, 16  ;;  %v865_v28 = vshrl.u32 %v704_v18, 16  ;;  %v974_v29 = vmax.bf16 %v835_v21, %v693_v12  ;;  %v975_v30 = vmax.bf16 %v840_v22, %v701_v3  ;;  %v3794_v3 = vld [vmem:[#allocation5 + $0xb4] ss:$8 sps:$4 sm:$0xff]   ;;  %2712 = vmatpush1.bf16.msra.mxu1 %v3786_v6 }
 0x23d   :  { %v978_v35 = vmax.bf16 %v855_v23, %v700_v13  ;;  %v1019_v0 = vrot.slane %v973_v2, %v4291_v4  ;;  %v4302_v36 = vrot.slane %v977_v25, %v4291_v4  ;;  %v979_v39 = vmax.bf16 %v860_v24, %v702_v10  ;;  %v3791_v13 = vld [vmem:[#allocation5 + $0x1a0] ss:$8 sps:$4 sm:$0xff]   ;;  %2713 = vmatprep.subr.bf16.mxu1 %v3794_v3 }
 0x23e   :  { %v976_v38 = vmax.bf16 %v845_v27, %v703_v17  ;;  %v4305_v40 = vrot.slane %v974_v29, %v4291_v4  ;;  %v1063_v41 = vrot.slane %v975_v30, %v4291_v4  ;;  %v980_v43 = vmax.bf16 %v865_v28, %v704_v18  ;;  %v632_v26 = vpop.permute.xlu1 %631  ;;  %v3792_v27 = vld [vmem:[#allocation5 + $0xb0] ss:$8 sps:$4 sm:$0xff]   ;;  %2755 = vmatpush1.bf16.msra.mxu0 %v3791_v13 }
 0x23f   :  { %v1020_v44 = vcombine.high %v1019_v0, %v1019_v0  ;;  %v1108_v54 = vcombine.high %v4302_v36, %v4302_v36  ;;  %v1129_v55 = vrot.slane %v978_v35, %v4291_v4  ;;  %v1027_v20 = vrot.slane %v1019_v0, %v4291_v4  ;;  %v630_v35 = vpop.permute.xlu0 %629  ;;  %2756 = vmatprep.subr.bf16.mxu0 %v3795_v16 }
 0x240   :  { %v1064_v49 = vcombine.high %v1063_v41, %v1063_v41  ;;  %v1049_v52 = vrot.slane %v4305_v40, %v4291_v4  ;;  %v1085_v53 = vrot.slane %v976_v38, %v4291_v4  ;;  %v1071_v33 = vrot.slane %v1063_v41, %v4291_v4  ;;  %2714 = vmatpush1.bf16.msra.mxu1 %v3792_v27 }
 0x241   :  { %v4321_v58 = vrot.slane %v979_v39, %v4291_v4  ;;  %v4325_v60 = vrot.slane %v1020_v44, %v4291_v4  ;;  %v1130_v19 = vcombine.high %v1129_v55, %v1129_v55  ;;  %v4328_v5 = vrot.slane %v980_v43, %v4291_v4  ;;  %2715 = vmatprep.subr.bf16.mxu1 %v3800_v1 }
 0x242   :  { %v1086_v63 = vcombine.high %v1085_v53, %v1085_v53  ;;  %v1078_v7 = vrot.slane %v1064_v49, %v4291_v4  ;;  %v1093_v8 = vrot.slane %v1085_v53, %v4291_v4  ;;  %v1115_v12 = vrot.slane %v4302_v36, %v4291_v4  ;;  %2757 = vmatpush1.bf16.msra.mxu0 %v3797_v34 }
 0x243   :  { %v1152_v32 = vcombine.high %v4321_v58, %v4321_v58  ;;  %v1042_v10 = vcombine.high %v4305_v40, %v4305_v40  ;;  %v1122_v14 = vrot.slane %v1108_v54, %v4291_v4  ;;  %v1367_v15 = vunpack.c.l.b16 %v1049_v52  ;;  %2758 = vmatprep.subr.bf16.mxu0 %v3801_v62  ;;  %v3809_v40 = vld [vmem:[#allocation5 + $0x1d0] ss:$8 sps:$4 sm:$0xff]  }
 0x244   :  { %v1100_v11 = vrot.slane %v1086_v63, %v4291_v4  ;;  %v1137_v17 = vrot.slane %v1129_v55, %v4291_v4  ;;  %v1159_v18 = vrot.slane %v4321_v58, %v4291_v4  ;;  %v1365_v21 = vunpack.c.l.b16 %v1027_v20 }
 0x245   :  { %v4343_v22 = vunpack.c.l.b16 %v1071_v33  ;;  %v1144_v23 = vrot.slane %v1130_v19, %v4291_v4  ;;  %v1174_v24 = vcombine.high %v4328_v5, %v4328_v5  ;;  %v1181_v2 = vrot.slane %v4328_v5, %v4291_v4  ;;  %v3812_v5 = vld [vmem:[#allocation5 + $0xe4] ss:$8 sps:$4 sm:$0xff]  }
 0x246   :  { %v1166_v28 = vrot.slane %v1152_v32, %v4291_v4  ;;  %v4352_v29 = vunpack.c.l.b16 %v1078_v7  ;;  %v4354_v30 = vunpack.c.l.b16 %v1093_v8  ;;  %v4356_v31 = vunpack.c.l.b16 %v1100_v11 }
 0x247   :  { %v1397_v0 = vrot.slane %v1367_v15, 7  ;;  %v1400_v36 = vrot.slane %v4343_v22, 6  ;;  %v705_v37 = vcombine.low %v645_v59, %v4310_v50  ;;  %v706_v9 = vcombine.high %v645_v59, %v4310_v50 }
 0x248   :  { %v4361_v38 = vunpack.c.l.b16 %v1115_v12  ;;  %v4363_v39 = vunpack.c.l.b16 %v1122_v14  ;;  %v636_v41 = vsel %vm633_vm9, %v630_v35, %v632_v26  ;;  %v648_v42 = vmax.bf16 %v632_v26, %v4281_v47 }
 0x249   :  { %v1399_v43 = vsel %vm1398_vm10, %v1397_v0, %v1365_v21  ;;  %v713_v44 = vrot.slane %v705_v37, %v4291_v4  ;;  %v720_v45 = vrot.slane %v706_v9, %v4291_v4  ;;  %v647_v48 = vmax.bf16 %v636_v41, %v4279_v46 }
 0x24a   :  { %v4371_v49 = vunpack.c.l.b16 %v1137_v17  ;;  %v4373_v50 = vunpack.c.l.b16 %v1144_v23  ;;  %v4376_v51 = vsel %vm1401_vm11, %v1400_v36, %v1399_v43  ;;  %v1512_v52 = vrot.slane %v4343_v22, 7 }
 0x24b   :  { %v721_v47 = vcombine.high %v713_v44, %v713_v44  ;;  %v722_v53 = vcombine.high %v720_v45, %v720_v45  ;;  %v729_v54 = vrot.slane %v713_v44, %v4291_v4  ;;  %v736_v55 = vrot.slane %v720_v45, %v4291_v4 }
 0x24c   :  { %v4381_v56 = vunpack.c.l.b16 %v1159_v18  ;;  %v4383_v46 = vunpack.c.l.b16 %v1166_v28  ;;  %v4385_v57 = vunpack.c.l.b16 %v1181_v2  ;;  %v755_v20 = vcombine.low %v647_v48, %v648_v42 }
 0x24d   :  { %v743_v33 = vrot.slane %v721_v47, %v4291_v4  ;;  %v750_v58 = vrot.slane %v722_v53, %v4291_v4  ;;  %v752_v59 = vcombine.high %v736_v55, %v736_v55  ;;  %v756_v63 = vcombine.high %v647_v48, %v648_v42 }
 0x24e   :  { %v870_v19 = vshrl.u32 %v729_v54, 16  ;;  %v890_v6 = vshrl.u32 %v736_v55, 16  ;;  %v763_v7 = vrot.slane %v755_v20, %v4291_v4  ;;  %v1514_v8 = vrot.slane %v4354_v30, 6 }
 0x24f   :  { %v753_v12 = vcombine.high %v743_v33, %v743_v33  ;;  %v754_v32 = vcombine.high %v750_v58, %v750_v58  ;;  %v1513_v13 = vsel %vm1398_vm10, %v1512_v52, %v1367_v15  ;;  %v1516_v3 = vrot.slane %v4361_v38, 5 }
 0x250   :  { %v895_v11 = vshrl.u32 %v750_v58, 16  ;;  %v900_v14 = vshrl.u32 %v752_v59, 16  ;;  %v981_v16 = vmax.bf16 %v870_v19, %v729_v54  ;;  %v985_v17 = vmax.bf16 %v890_v6, %v736_v55 }
 0x251   :  { %v4393_v18 = vcombine.high %v729_v54, %v729_v54  ;;  %v905_v21 = vshrl.u32 %v754_v32, 16  ;;  %v770_v23 = vrot.slane %v756_v63, %v4291_v4  ;;  %v1518_v2 = vrot.slane %v4371_v49, 4 }
 0x252   :  { %v986_v26 = vmax.bf16 %v895_v11, %v750_v58  ;;  %v987_v27 = vmax.bf16 %v900_v14, %v752_v59  ;;  %v1195_v28 = vrot.slane %v985_v17, %v4291_v4  ;;  %v771_v34 = vcombine.high %v763_v7, %v763_v7 }
 0x253   :  { %v875_v35 = vshrl.u32 %v743_v33, 16  ;;  %v885_v15 = vshrl.u32 %v753_v12, 16  ;;  %v988_v0 = vmax.bf16 %v905_v21, %v754_v32  ;;  %v4399_v36 = vsel %vm1401_vm11, %v1514_v8, %v1513_v13 }
 0x254   :  { %v1196_v37 = vcombine.high %v1195_v28, %v1195_v28  ;;  %v4402_v9 = vrot.slane %v986_v26, %v4291_v4  ;;  %v1239_v41 = vrot.slane %v987_v27, %v4291_v4  ;;  %v4406_v42 = vrot.slane %v981_v16, %v4291_v4 }
 0x255   :  { %v1261_v44 = vrot.slane %v988_v0, %v4291_v4  ;;  %v779_v45 = vrot.slane %v763_v7, %v4291_v4  ;;  %v1520_v48 = vrot.slane %v4381_v56, 3  ;;  %v1203_v52 = vrot.slane %v1195_v28, %v4291_v4 }
 0x256   :  { %v1225_v47 = vrot.slane %v4402_v9, %v4291_v4  ;;  %v772_v53 = vcombine.high %v770_v23, %v770_v23  ;;  %v793_v54 = vrot.slane %v771_v34, %v4291_v4  ;;  %v4416_v55 = vmax.bf16 %v875_v35, %v743_v33 }
 0x257   :  { %v4418_v20 = vmax.bf16 %v885_v15, %v753_v12  ;;  %v1240_v58 = vcombine.high %v1239_v41, %v1239_v41  ;;  %v1247_v59 = vrot.slane %v1239_v41, %v4291_v4  ;;  %v4422_v63 = vrot.slane %v1196_v37, %v4291_v4 }
 0x258   :  { %v4424_v19 = vunpack.c.l.b16 %v1225_v47  ;;  %v1471_v6 = vcombine.high %v4406_v42, %v4406_v42  ;;  %v786_v7 = vrot.slane %v770_v23, %v4291_v4  ;;  %v1262_v8 = vcombine.high %v1261_v44, %v1261_v44 }
 0x259   :  { %v4431_v12 = vunpack.c.l.b16 %v1247_v59  ;;  %v801_v32 = vcombine.high %v779_v45, %v779_v45  ;;  %v1381_v13 = vunpack.c.l.b16 %v1203_v52  ;;  %v800_v14 = vrot.slane %v772_v53, %v4291_v4 }
 0x25a   :  { %v1432_v11 = vrot.slane %v4424_v19, 7  ;;  %v803_v16 = vcombine.high %v793_v54, %v793_v54  ;;  %v1254_v17 = vrot.slane %v1240_v58, %v4291_v4  ;;  %v1269_v21 = vrot.slane %v1261_v44, %v4291_v4 }
 0x25b   :  { %v1434_v23 = vrot.slane %v4431_v12, 6  ;;  %v910_v26 = vshrl.u32 %v779_v45, 16  ;;  %v915_v28 = vshrl.u32 %v793_v54, 16  ;;  %v920_v34 = vshrl.u32 %v801_v32, 16 }
 0x25c   :  { %v1433_v27 = vsel %vm1398_vm10, %v1432_v11, %v1381_v13  ;;  %v925_v35 = vshrl.u32 %v803_v16, 16  ;;  %v1276_v15 = vrot.slane %v1262_v8, %v4291_v4  ;;  %v930_v41 = vshrl.u32 %v786_v7, 16  ;;  %v3798_v11 = vld [vmem:[#allocation5 + $0xc0] ss:$8 sps:$4 sm:$0xff]  }
 0x25d   :  { %v4442_v37 = vsel %vm1401_vm11, %v1434_v23, %v1433_v27  ;;  %v935_v44 = vshrl.u32 %v800_v14, 16  ;;  %v989_v52 = vmax.bf16 %v910_v26, %v779_v45  ;;  %v990_v47 = vmax.bf16 %v915_v28, %v793_v54  ;;  %v3803_v54 = vld [vmem:[#allocation5 + $0x1c0] ss:$8 sps:$4 sm:$0xff]   ;;  %2716 = vmatpush1.bf16.msra.mxu1 %v3798_v11 }
 0x25e   :  { %v991_v53 = vmax.bf16 %v920_v34, %v801_v32  ;;  %v4444_v58 = vunpack.c.l.b16 %v1269_v21  ;;  %v4446_v59 = vcombine.high %v786_v7, %v786_v7  ;;  %v992_v13 = vmax.bf16 %v925_v35, %v803_v16  ;;  %2759 = vmatpush1.bf16.msra.mxu0 %v3803_v54 }
 0x25f   :  { %v1478_v8 = vrot.slane %v4406_v42, %v4291_v4  ;;  %v993_v23 = vmax.bf16 %v930_v41, %v786_v7  ;;  %v1283_v27 = vrot.slane %v989_v52, %v4291_v4  ;;  %v1305_v0 = vrot.slane %v990_v47, %v4291_v4 }
 0x260   :  { %v1327_v45 = vrot.slane %v991_v53, %v4291_v4  ;;  %v4453_v32 = vunpack.c.l.b16 %v1254_v17  ;;  %v4455_v21 = vunpack.c.l.b16 %v1276_v15  ;;  %v4457_v26 = vcombine.high %v800_v14, %v800_v14 }
 0x261   :  { %v4460_v16 = vrot.slane %v992_v13, %v4291_v4  ;;  %v1284_v28 = vcombine.high %v1283_v27, %v1283_v27  ;;  %v1291_v7 = vrot.slane %v1283_v27, %v4291_v4  ;;  %v1306_v34 = vcombine.high %v1305_v0, %v1305_v0 }
 0x262   :  { %v1313_v35 = vrot.slane %v1305_v0, %v4291_v4  ;;  %v1328_v41 = vcombine.high %v1327_v45, %v1327_v45  ;;  %v1335_v17 = vrot.slane %v1327_v45, %v4291_v4  ;;  %v4465_v52 = vunpack.c.l.b16 %v1478_v8 }
 0x263   :  { %v1517_v15 = vsel %vm1404_vm12, %v1516_v3, %v4399_v36  ;;  %v4472_v1 = vmax.bf16 %v935_v44, %v800_v14  ;;  %v4477_v0 = vrot.slane %v993_v23, %v4291_v4  ;;  %v4480_v53 = vrot.slane %v1284_v28, %v4291_v4  ;;  %v3804_v28 = vld [vmem:[#allocation5 + $0xd0] ss:$8 sps:$4 sm:$0xff]  }
 0x264   :  { %v4483_v13 = vrot.slane %v1306_v34, %v4291_v4  ;;  %v1357_v3 = vrot.slane %v4460_v16, %v4291_v4  ;;  %v4487_v36 = vunpack.c.l.b16 %v1291_v7  ;;  %v4490_v14 = vrot.slane %v1328_v41, %v4291_v4  ;;  %v3806_v7 = vld [vmem:[#allocation5 + $0xd4] ss:$8 sps:$4 sm:$0xff]  }
 0x265   :  { %v4492_v44 = vunpack.c.l.b16 %v1313_v35  ;;  %v1519_v8 = vsel %vm1407_vm13, %v1518_v2, %v1517_v15  ;;  %v1522_v11 = vrot.slane %v4385_v57, 2  ;;  %v4498_v23 = vunpack.c.l.b16 %v1335_v17  ;;  %v3807_v41 = vld [vmem:[#allocation5 + $0x1d4] ss:$8 sps:$4 sm:$0xff]   ;;  %2717 = vmatprep.subr.bf16.mxu1 %v3806_v7 }
 0x266   :  { %v1521_v27 = vsel %vm1410_vm14, %v1520_v48, %v1519_v8  ;;  %v1524_v45 = vrot.slane %v4465_v52, 1  ;;  %v4508_v54 = vrot.slane %v1042_v10, %v4291_v4  ;;  %v1188_v34 = vrot.slane %v1174_v24, %v4291_v4  ;;  %2760 = vmatprep.subr.bf16.mxu0 %v3807_v41  ;;  %2718 = vmatpush1.bf16.msra.mxu1 %v3804_v28 }
 0x267   :  { %v1523_v2 = vsel %vm1413_vm15, %v1522_v11, %v1521_v27  ;;  %v1485_v48 = vrot.slane %v1471_v6, %v4291_v4  ;;  %v1526_v35 = vrot.slane %v4352_v29, 7  ;;  %v4520_v10 = vunpack.c.l.b16 %v1357_v3  ;;  %v3810_v6 = vld [vmem:[#allocation5 + $0xe0] ss:$8 sps:$4 sm:$0xff]   ;;  %v3813_v3 = vld [vmem:[#allocation5 + $0x1e4] ss:$8 sps:$4 sm:$0xff]   ;;  %2761 = vmatpush1.bf16.msra.mxu0 %v3809_v40  ;;  %2719 = vmatprep.subr.bf16.mxu1 %v3812_v5 }
 0x268   :  { %v1525_v17 = vsel %vm1416_vm0, %v1524_v45, %v1523_v2  ;;  %v5008_v15 = vunpack.c.l.b16 %v4508_v54  ;;  %v1528_v8 = vrot.slane %v4356_v31, 6  ;;  %v4525_v11 = vunpack.c.l.b16 %v1188_v34  ;;  %2762 = vmatprep.subr.bf16.mxu0 %v3813_v3  ;;  %v3816_v3 = vld [vmem:[#allocation5 + $0xf0] ss:$8 sps:$4 sm:$0xff]  }
 0x269   :  { %v1568_v24 = vpack.c.b16 %v1525_v17, %v1525_v17  ;;  %v4527_v27 = vunpack.c.l.b16 %v1485_v48  ;;  %v1530_v42 = vrot.slane %v4363_v39, 5  ;;  %v1532_v2 = vrot.slane %v4373_v50, 4  ;;  %v3815_v48 = vld [vmem:[#allocation5 + $0x1e0] ss:$8 sps:$4 sm:$0xff]   ;;  %v3818_v17 = vld [vmem:[#allocation5 + $0xf4] ss:$8 sps:$4 sm:$0xff]  }
 0x26a   :  { %v1527_v45 = vsel %vm1398_vm10, %v1526_v35, %v5008_v15  ;;  %v1534_v7 = vrot.slane %v4383_v46, 3  ;;  %v1500_v34 = vrot.slane %v4477_v0, %v4291_v4  ;;  %v1536_v41 = vrot.slane %v4525_v11, 2  ;;  %v3819_v15 = vld [vmem:[#allocation5 + $0x1f4] ss:$8 sps:$4 sm:$0xff]   ;;  %2720 = vmatpush1.bf16.msra.mxu1 %v3810_v6 }
 0x26b   :  { %1572 = vrot.lane.b32.xlu0 %v1568_v24, %s4039_s1  ;;  %v1529_v28 = vsel %vm1401_vm11, %v1528_v8, %v1527_v45  ;;  %v1538_v25 = vrot.slane %v4527_v27, 1  ;;  %v1540_v35 = vrot.slane %v4431_v12, 7  ;;  %v1542_v40 = vrot.slane %v4444_v58, 6  ;;  %2763 = vmatpush1.bf16.msra.mxu0 %v3815_v48 }
 0x26c   :  { %v1531_v62 = vsel %vm1404_vm12, %v1530_v42, %v1529_v28  ;;  %v4543_v43 = vunpack.c.l.b16 %v1500_v34  ;;  %v1544_v5 = vrot.slane %v4487_v36, 5  ;;  %v1546_v45 = vrot.slane %v4492_v44, 4  ;;  %2721 = vmatprep.subr.bf16.mxu1 %v3818_v17  ;;  %2764 = vmatprep.subr.bf16.mxu0 %v3819_v15 }
 0x26d   :  { %v1533_v24 = vsel %vm1407_vm13, %v1532_v2, %v1531_v62  ;;  %v1541_v8 = vsel %vm1398_vm10, %v1540_v35, %v4424_v19  ;;  %v1548_v47 = vrot.slane %v4498_v23, 3  ;;  %v1493_v42 = vcombine.high %v4477_v0, %v4477_v0  ;;  %v3821_v62 = vld [vmem:[#allocation5 + $0x1f0] ss:$8 sps:$4 sm:$0xff]  }
 0x26e   :  { %v1535_v34 = vsel %vm1410_vm14, %v1534_v7, %v1533_v24  ;;  %v1543_v28 = vsel %vm1401_vm11, %v1542_v40, %v1541_v8  ;;  %v1550_v33 = vrot.slane %v4520_v10, 2  ;;  %v4561_v6 = vrot.slane %v4416_v55, %v4291_v4  ;;  %2722 = vmatpush1.bf16.msra.mxu1 %v3816_v3 }
 0x26f   :  { %v1537_v19 = vsel %vm1413_vm15, %v1536_v41, %v1535_v34  ;;  %v1545_v2 = vsel %vm1404_vm12, %v1544_v5, %v1543_v28  ;;  %v4565_v0 = vrot.slane %v4472_v1, %v4291_v4  ;;  %v1552_v48 = vrot.slane %v4543_v43, 1  ;;  %2765 = vmatpush1.bf16.msra.mxu0 %v3821_v62 }
 0x270   :  { %v1539_v7 = vsel %vm1416_vm0, %v1538_v25, %v1537_v19  ;;  %v1547_v35 = vsel %vm1407_vm13, %v1546_v45, %v1545_v2  ;;  %v1632_v17 = vrot.slane %v4354_v30, 7  ;;  %v1598_v55 = vrot.slane %v4561_v6, %v4291_v4 }
 0x271   :  { %v1569_v41 = vpack.c.b16 %v1539_v7, %v1539_v7  ;;  %v1549_v40 = vsel %vm1410_vm14, %v1548_v47, %v1547_v35  ;;  %v1634_v5 = vrot.slane %v4361_v38, 6  ;;  %v4576_v1 = vunpack.c.l.b16 %v4480_v53 }
 0x272   :  { %v1551_v25 = vsel %vm1413_vm15, %v1550_v33, %v1549_v40  ;;  %v1620_v15 = vrot.slane %v4565_v0, %v4291_v4  ;;  %v1633_v24 = vsel %vm1398_vm10, %v1632_v17, %v4343_v22  ;;  %v4585_v8 = vunpack.c.l.b16 %v1598_v55 }
 0x273   :  { %1574 = vrot.lane.b32.xlu1 %v1569_v41, %s4039_s1  ;;  %v1553_v47 = vsel %vm1416_vm0, %v1552_v48, %v1551_v25  ;;  %v1635_v45 = vsel %vm1401_vm11, %v1634_v5, %v1633_v24  ;;  %v1636_v53 = vrot.slane %v4371_v49, 5  ;;  %v1638_v33 = vrot.slane %v4381_v56, 4 }
 0x274   :  { %v1570_v3 = vpack.c.b16 %v1553_v47, %v1553_v47  ;;  %v4589_v34 = vunpack.c.l.b16 %v1620_v15  ;;  %v1640_v28 = vrot.slane %v4385_v57, 3  ;;  %v1642_v62 = vrot.slane %v4465_v52, 2 }
 0x275   :  { %v1637_v22 = vsel %vm1404_vm12, %v1636_v53, %v1635_v45  ;;  %v1644_v19 = vrot.slane %v4585_v8, 1  ;;  %v1660_v2 = vrot.slane %v4444_v58, 7  ;;  %v1662_v35 = vrot.slane %v4487_v36, 6 }
 0x276   :  { %1576 = vrot.lane.b32.xlu0 %v1570_v3, %s4039_s1  ;;  %v1639_v7 = vsel %vm1407_vm13, %v1638_v33, %v1637_v22  ;;  %v1664_v48 = vrot.slane %v4492_v44, 5  ;;  %v1666_v17 = vrot.slane %v4498_v23, 4  ;;  %v4603_v41 = vunpack.c.l.b16 %v4483_v13 }
 0x277   :  { %v1641_v40 = vsel %vm1410_vm14, %v1640_v28, %v1639_v7  ;;  %v1661_v55 = vsel %vm1398_vm10, %v1660_v2, %v4431_v12  ;;  %v1668_v5 = vrot.slane %v4520_v10, 3  ;;  %v4610_v25 = vunpack.c.l.b16 %v4490_v14 }
 0x278   :  { %v1643_v15 = vsel %vm1413_vm15, %v1642_v62, %v1641_v40  ;;  %v1663_v24 = vsel %vm1401_vm11, %v1662_v35, %v1661_v55  ;;  %v1670_v47 = vrot.slane %v4543_v43, 2  ;;  %v1672_v53 = vrot.slane %v4589_v34, 1 }
 0x279   :  { %v1645_v45 = vsel %vm1416_vm0, %v1644_v19, %v1643_v15  ;;  %v1665_v13 = vsel %vm1404_vm12, %v1664_v48, %v1663_v24  ;;  %v5009_v12 = vcombine.high %v4402_v9, %v4402_v9  ;;  %v5010_v33 = vcombine.high %v4460_v16, %v4460_v16 }
 0x27a   :  { %v1667_v14 = vsel %vm1407_vm13, %v1666_v17, %v1665_v13  ;;  %v1507_v22 = vrot.slane %v1493_v42, %v4291_v4  ;;  %v1554_v62 = vrot.slane %v4453_v32, 7  ;;  %v1556_v7 = vrot.slane %v4455_v21, 6 }
 0x27b   :  { %v4622_v3 = vrot.slane %v5009_v12, %v4291_v4  ;;  %v1364_v28 = vrot.slane %v5010_v33, %v4291_v4  ;;  %v1669_v19 = vsel %vm1410_vm14, %v1668_v5, %v1667_v14  ;;  %v1558_v9 = vrot.slane %v4576_v1, 5 }
 0x27c   :  { %v1671_v35 = vsel %vm1413_vm15, %v1670_v47, %v1669_v19  ;;  %v4638_v17 = vunpack.c.l.b16 %v1507_v22  ;;  %v1560_v16 = vrot.slane %v4603_v41, 4  ;;  %v1591_v42 = vcombine.high %v4561_v6, %v4561_v6 }
 0x27d   :  { %v1384_v2 = vunpack.c.l.b16 %v4622_v3  ;;  %v4636_v48 = vunpack.c.l.b16 %v1364_v28  ;;  %v1673_v40 = vsel %vm1416_vm0, %v1672_v53, %v1671_v35  ;;  %v1562_v5 = vrot.slane %v4610_v25, 3  ;;  %v3824_v28 = vld [vmem:[#allocation5 + $0x204] ss:$8 sps:$4 sm:$0xff]  }
 0x27e   :  { %v2076_v15 = vpack.c.b16 %v1673_v40, %v1645_v45  ;;  %v1566_v13 = vrot.slane %v4638_v17, 1  ;;  %v5011_v6 = vshrl.u32 %v4393_v18, 16  ;;  %v1740_v53 = vrot.slane %v4361_v38, 7  ;;  %2777 = vmatprep.subr.bf16.mxu0 %v3824_v28 }
 0x27f   :  { %v1555_v55 = vsel %vm1398_vm10, %v1554_v62, %v1384_v2  ;;  %v1564_v47 = vrot.slane %v4636_v48, 2  ;;  %v1742_v33 = vrot.slane %v4371_v49, 6  ;;  %v1744_v22 = vrot.slane %v4381_v56, 5 }
 0x280   :  { %v1557_v24 = vsel %vm1401_vm11, %v1556_v7, %v1555_v55  ;;  %v983_v14 = vmax.bf16 %v5011_v6, %v4393_v18  ;;  %2766 = vmatprep.mubr.bf16.mxu0 %v2076_v15  ;;  %v1746_v62 = vrot.slane %v4385_v57, 4  ;;  %v1748_v19 = vrot.slane %v4465_v52, 3 }
 0x281   :  { %v1559_v12 = vsel %vm1404_vm12, %v1558_v9, %v1557_v24  ;;  %v1741_v18 = vsel %vm1398_vm10, %v1740_v53, %v4354_v30  ;;  %v1750_v35 = vrot.slane %v4585_v8, 2  ;;  %v1605_v55 = vrot.slane %v1591_v42, %v4291_v4 }
 0x282   :  { %v1561_v45 = vsel %vm1407_vm13, %v1560_v16, %v1559_v12  ;;  %v1698_v9 = vrot.slane %v983_v14, %v4291_v4  ;;  %v1743_v16 = vsel %vm1401_vm11, %v1742_v33, %v1741_v18  ;;  %v1754_v15 = vrot.slane %v4363_v39, 7 }
 0x283   :  { %v1563_v7 = vsel %vm1410_vm14, %v1562_v5, %v1561_v45  ;;  %v1745_v12 = vsel %vm1404_vm12, %v1744_v22, %v1743_v16  ;;  %v4674_v45 = vunpack.c.l.b16 %v1605_v55  ;;  %v945_v18 = vshrl.u32 %v4457_v26, 16 }
 0x284   :  { %v1565_v40 = vsel %vm1413_vm15, %v1564_v47, %v1563_v7  ;;  %v1706_v5 = vrot.slane %v1698_v9, %v4291_v4  ;;  %v1699_v6 = vcombine.high %v1698_v9, %v1698_v9  ;;  %v1747_v53 = vsel %vm1407_vm13, %v1746_v62, %v1745_v12 }
 0x285   :  { %v1567_v24 = vsel %vm1416_vm0, %v1566_v13, %v1565_v40  ;;  %v1755_v47 = vsel %vm1398_vm10, %v1754_v15, %v4356_v31  ;;  %v1749_v42 = vsel %vm1410_vm14, %v1748_v19, %v1747_v53  ;;  %v1756_v13 = vrot.slane %v4373_v50, 6 }
 0x286   :  { %v1571_v14 = vpack.c.b16 %v1567_v24, %v1567_v24  ;;  %v4678_v33 = vunpack.c.l.b16 %v1706_v5  ;;  %v4682_v28 = vrot.slane %v1699_v6, %v4291_v4  ;;  %v1751_v22 = vsel %vm1413_vm15, %v1750_v35, %v1749_v42 }
 0x287   :  { %v1758_v62 = vrot.slane %v4383_v46, 5  ;;  %v1760_v7 = vrot.slane %v4525_v11, 4  ;;  %v1762_v9 = vrot.slane %v4527_v27, 3  ;;  %v1757_v16 = vsel %vm1401_vm11, %v1756_v13, %v1755_v47 }
 0x288   :  { %1578 = vrot.lane.b32.xlu1 %v1571_v14, %s4039_s1  ;;  %v1752_v40 = vrot.slane %v4678_v33, 1  ;;  %v1737_v19 = vunpack.c.l.b16 %v4682_v28  ;;  %v1764_v15 = vrot.slane %v4674_v45, 2  ;;  %v5012_v35 = vshrl.u32 %v4446_v59, 16 }
 0x289   :  { %v1759_v55 = vsel %vm1404_vm12, %v1758_v62, %v1757_v16  ;;  %v1768_v5 = vrot.slane %v4487_v36, 7  ;;  %v1613_v12 = vcombine.high %v4565_v0, %v4565_v0  ;;  %v1770_v16 = vrot.slane %v4492_v44, 6 }
 0x28a   :  { %v995_v24 = vmax.bf16 %v5012_v35, %v4446_v59  ;;  %v1753_v6 = vsel %vm1416_vm0, %v1752_v40, %v1751_v22  ;;  %v1761_v14 = vsel %vm1407_vm13, %v1760_v7, %v1759_v55  ;;  %v1766_v53 = vrot.slane %v1737_v19, 1 }
 0x28b   :  { %v1796_v47 = vpack.c.b16 %v1753_v6, %v1753_v6  ;;  %v1763_v42 = vsel %vm1410_vm14, %v1762_v9, %v1761_v14  ;;  %v1769_v59 = vsel %vm1398_vm10, %v1768_v5, %v4444_v58  ;;  %v1772_v0 = vrot.slane %v4498_v23, 5 }
 0x28c   :  { %v1720_v13 = vrot.slane %v995_v24, %v4291_v4  ;;  %v1765_v62 = vsel %vm1413_vm15, %v1764_v15, %v1763_v42  ;;  %v1774_v22 = vrot.slane %v4520_v10, 4  ;;  %v1776_v9 = vrot.slane %v4543_v43, 3 }
 0x28d   :  { %1800 = vrot.lane.b32.xlu0 %v1796_v47, %s4039_s1  ;;  %v1767_v7 = vsel %vm1416_vm0, %v1766_v53, %v1765_v62  ;;  %v1778_v55 = vrot.slane %v4589_v34, 2  ;;  %v1771_v24 = vsel %vm1401_vm11, %v1770_v16, %v1769_v59  ;;  %v1627_v15 = vrot.slane %v1613_v12, %v4291_v4 }
 0x28e   :  { %v1728_v40 = vrot.slane %v1720_v13, %v4291_v4  ;;  %v1797_v35 = vpack.c.b16 %v1767_v7, %v1767_v7  ;;  %v1721_v5 = vcombine.high %v1720_v13, %v1720_v13  ;;  %v1773_v14 = vsel %vm1404_vm12, %v1772_v0, %v1771_v24 }
 0x28f   :  { %v1782_v47 = vrot.slane %v4576_v1, 7  ;;  %v1784_v53 = vrot.slane %v4603_v41, 6  ;;  %v1775_v42 = vsel %vm1407_vm13, %v1774_v22, %v1773_v14  ;;  %v4728_v62 = vunpack.c.l.b16 %v1627_v15 }
 0x290   :  { %v4721_v6 = vunpack.c.l.b16 %v1728_v40  ;;  %1802 = vrot.lane.b32.xlu1 %v1797_v35, %s4039_s1  ;;  %v4731_v7 = vrot.slane %v1721_v5, %v4291_v4  ;;  %v1786_v12 = vrot.slane %v4610_v25, 5  ;;  %v5013_v13 = vunpack.c.l.b16 %v4508_v54 }
 0x291   :  { %v1777_v16 = vsel %vm1410_vm14, %v1776_v9, %v1775_v42  ;;  %v1783_v40 = vsel %vm1398_vm10, %v1782_v47, %v4455_v21  ;;  %v1788_v15 = vrot.slane %v4636_v48, 4  ;;  %v1446_v5 = vrot.slane %v1384_v2, 7 }
 0x292   :  { %v1418_v59 = vrot.slane %v5013_v13, 7  ;;  %v1780_v0 = vrot.slane %v4721_v6, 1  ;;  %v1779_v35 = vsel %vm1413_vm15, %v1778_v55, %v1777_v16  ;;  %v1739_v22 = vunpack.c.l.b16 %v4731_v7 }
 0x293   :  { %v1785_v24 = vsel %vm1401_vm11, %v1784_v53, %v1783_v40  ;;  %v1790_v14 = vrot.slane %v4638_v17, 3  ;;  %v1792_v55 = vrot.slane %v4728_v62, 2  ;;  %v5014_v16 = vunpack.c.l.b16 %v4325_v60 }
 0x294   :  { %v1781_v54 = vsel %vm1416_vm0, %v1780_v0, %v1779_v35  ;;  %v1787_v9 = vsel %vm1404_vm12, %v1786_v12, %v1785_v24  ;;  %v1794_v13 = vrot.slane %v1739_v22, 1  ;;  %v1420_v2 = vrot.slane %v4352_v29, 6 }
 0x295   :  { %v1798_v42 = vpack.c.b16 %v1781_v54, %v1781_v54  ;;  %v1789_v47 = vsel %vm1407_vm13, %v1788_v15, %v1787_v9  ;;  %v1419_v3 = vsel %vm1398_vm10, %v1418_v59, %v5014_v16  ;;  %v1422_v12 = vrot.slane %v4356_v31, 5 }
 0x296   :  { %v1791_v53 = vsel %vm1410_vm14, %v1790_v14, %v1789_v47  ;;  %v4760_v0 = vmax.bf16 %v945_v18, %v4457_v26  ;;  %v1424_v35 = vrot.slane %v4363_v39, 4  ;;  %v1426_v24 = vrot.slane %v4373_v50, 3 }
 0x297   :  { %1804 = vrot.lane.b32.xlu0 %v1798_v42, %s4039_s1  ;;  %v1793_v40 = vsel %vm1413_vm15, %v1792_v55, %v1791_v53  ;;  %v1421_v60 = vsel %vm1401_vm11, %v1420_v2, %v1419_v3  ;;  %v1428_v59 = vrot.slane %v4383_v46, 2  ;;  %v5015_v54 = vunpack.c.l.b16 %v4422_v63 }
 0x298   :  { %v1795_v15 = vsel %vm1416_vm0, %v1794_v13, %v1793_v40  ;;  %v1423_v18 = vsel %vm1404_vm12, %v1422_v12, %v1421_v60  ;;  %v1448_v14 = vrot.slane %v4453_v32, 6  ;;  %v1450_v42 = vrot.slane %v4455_v21, 5 }
 0x299   :  { %v1447_v9 = vsel %vm1398_vm10, %v1446_v5, %v5015_v54  ;;  %v1799_v26 = vpack.c.b16 %v1795_v15, %v1795_v15  ;;  %v1425_v47 = vsel %vm1407_vm13, %v1424_v35, %v1423_v18  ;;  %v1430_v55 = vrot.slane %v4525_v11, 1 }
 0x29a   :  { %v1452_v13 = vrot.slane %v4576_v1, 4  ;;  %v1454_v53 = vrot.slane %v4603_v41, 3  ;;  %v1427_v63 = vsel %vm1410_vm14, %v1426_v24, %v1425_v47  ;;  %v1449_v5 = vsel %vm1401_vm11, %v1448_v14, %v1447_v9 }
 0x29b   :  { %1806 = vrot.lane.b32.xlu1 %v1799_v26, %s4039_s1  ;;  %v1456_v16 = vrot.slane %v4610_v25, 2  ;;  %v1646_v3 = vrot.slane %v4356_v31, 7  ;;  %v1429_v2 = vsel %vm1413_vm15, %v1428_v59, %v1427_v63  ;;  %v1451_v12 = vsel %vm1404_vm12, %v1450_v42, %v1449_v5 }
 0x29c   :  { %v1458_v40 = vrot.slane %v4636_v48, 1  ;;  %v1648_v35 = vrot.slane %v4363_v39, 6  ;;  %v4789_v15 = vsel %vm1416_vm0, %v1430_v55, %v1429_v2  ;;  %v1453_v60 = vsel %vm1407_vm13, %v1452_v13, %v1451_v12 }
 0x29d   :  { %v1647_v24 = vsel %vm1398_vm10, %v1646_v3, %v4352_v29  ;;  %v1650_v54 = vrot.slane %v4373_v50, 5  ;;  %v1455_v31 = vsel %vm1410_vm14, %v1454_v53, %v1453_v60  ;;  %v1652_v9 = vrot.slane %v4383_v46, 4 }
 0x29e   :  { %v1649_v59 = vsel %vm1401_vm11, %v1648_v35, %v1647_v24  ;;  %v1654_v26 = vrot.slane %v4525_v11, 3  ;;  %v1457_v18 = vsel %vm1413_vm15, %v1456_v16, %v1455_v31  ;;  %v1656_v42 = vrot.slane %v4527_v27, 2 }
 0x29f   :  { %v1651_v14 = vsel %vm1404_vm12, %v1650_v54, %v1649_v59  ;;  %v1658_v47 = vrot.slane %v4674_v45, 1  ;;  %v1868_v29 = vrot.slane %v4585_v8, 3  ;;  %v4805_v55 = vsel %vm1416_vm0, %v1458_v40, %v1457_v18 }
 0x2a0   :  { %v1653_v13 = vsel %vm1407_vm13, %v1652_v9, %v1651_v14  ;;  %v1403_v53 = vrot.slane %v4354_v30, 5  ;;  %v4811_v63 = vrot.slane %v1737_v19, 2  ;;  %v1406_v16 = vrot.slane %v4361_v38, 4 }
 0x2a1   :  { %v1655_v5 = vsel %vm1410_vm14, %v1654_v26, %v1653_v13  ;;  %v1409_v3 = vrot.slane %v4371_v49, 3  ;;  %v1412_v40 = vrot.slane %v4381_v56, 2  ;;  %v1436_v35 = vrot.slane %v4444_v58, 5 }
 0x2a2   :  { %v1657_v2 = vsel %vm1413_vm15, %v1656_v42, %v1655_v5  ;;  %v1405_v12 = vsel %vm1404_vm12, %v1403_v53, %v4376_v51  ;;  %v1438_v19 = vrot.slane %v4487_v36, 4  ;;  %v1440_v60 = vrot.slane %v4492_v44, 3 }
 0x2a3   :  { %v4822_v30 = vsel %vm1416_vm0, %v1658_v47, %v1657_v2  ;;  %v1408_v28 = vsel %vm1407_vm13, %v1406_v16, %v1405_v12  ;;  %v1415_v54 = vrot.slane %v4385_v57, 1  ;;  %v1437_v51 = vsel %vm1404_vm12, %v1436_v35, %v4442_v37 }
 0x2a4   :  { %v1411_v24 = vsel %vm1410_vm14, %v1409_v3, %v1408_v28  ;;  %v1442_v31 = vrot.slane %v4498_v23, 2  ;;  %v1439_v59 = vsel %vm1407_vm13, %v1438_v19, %v1437_v51  ;;  %v1444_v9 = vrot.slane %v4520_v10, 1 }
 0x2a5   :  { %v1414_v58 = vsel %vm1413_vm15, %v1412_v40, %v1411_v24  ;;  %v1674_v26 = vrot.slane %v4455_v21, 7  ;;  %v1441_v14 = vsel %vm1410_vm14, %v1440_v60, %v1439_v59  ;;  %v1676_v42 = vrot.slane %v4576_v1, 6 }
 0x2a6   :  { %v4837_v18 = vsel %vm1416_vm0, %v1415_v54, %v1414_v58  ;;  %v1678_v47 = vrot.slane %v4603_v41, 5  ;;  %v1443_v37 = vsel %vm1413_vm15, %v1442_v31, %v1441_v14  ;;  %v1680_v53 = vrot.slane %v4610_v25, 4 }
 0x2a7   :  { %v1675_v13 = vsel %vm1398_vm10, %v1674_v26, %v4453_v32  ;;  %v1682_v5 = vrot.slane %v4636_v48, 3  ;;  %v4848_v21 = vsel %vm1416_vm0, %v1444_v9, %v1443_v37  ;;  %v1684_v3 = vrot.slane %v4638_v17, 2 }
 0x2a8   :  { %v1677_v16 = vsel %vm1401_vm11, %v1676_v42, %v1675_v13  ;;  %v1686_v2 = vrot.slane %v4728_v62, 1  ;;  %v2073_v12 = vpack.c.b16 %v4848_v21, %v4837_v18  ;;  %v1818_v32 = vrot.slane %v4418_v20, %v4291_v4  ;;  %v3833_v18 = vld [vmem:[#allocation5 + $0x234] ss:$8 sps:$4 sm:$0xff]  }
 0x2a9   :  { %v1679_v40 = vsel %vm1404_vm12, %v1678_v47, %v1677_v16  ;;  %v1840_v35 = vrot.slane %v4760_v0, %v4291_v4  ;;  %v1874_v19 = vrot.slane %v4373_v50, 7  ;;  %v1876_v60 = vrot.slane %v4383_v46, 6 }
 0x2aa   :  { %v1681_v28 = vsel %vm1407_vm13, %v1680_v53, %v1679_v40  ;;  %v1878_v24 = vrot.slane %v4525_v11, 5  ;;  %v1819_v51 = vcombine.high %v1818_v32, %v1818_v32  ;;  %v1880_v58 = vrot.slane %v4527_v27, 4 }
 0x2ab   :  { %v1683_v54 = vsel %vm1410_vm14, %v1682_v5, %v1681_v28  ;;  %v1841_v31 = vcombine.high %v1840_v35, %v1840_v35  ;;  %v1875_v20 = vsel %vm1398_vm10, %v1874_v19, %v4363_v39  ;;  %v1882_v0 = vrot.slane %v4674_v45, 3 }
 0x2ac   :  { %v1685_v59 = vsel %vm1413_vm15, %v1684_v3, %v1683_v54  ;;  %v1902_v9 = vrot.slane %v4603_v41, 7  ;;  %v1833_v46 = vrot.slane %v1819_v51, %v4291_v4  ;;  %v1877_v26 = vsel %vm1401_vm11, %v1876_v60, %v1875_v20 }
 0x2ad   :  { %v4872_v50 = vsel %vm1416_vm0, %v1686_v2, %v1685_v59  ;;  %v1855_v11 = vrot.slane %v1841_v31, %v4291_v4  ;;  %v1912_v27 = vrot.slane %v1739_v22, 2  ;;  %v1879_v14 = vsel %vm1404_vm12, %v1878_v24, %v1877_v26 }
 0x2ae   :  { %v1903_v39 = vsel %vm1398_vm10, %v1902_v9, %v4576_v1  ;;  %v1904_v45 = vrot.slane %v4610_v25, 6  ;;  %v1857_v41 = vunpack.c.l.b16 %v1833_v46  ;;  %v1881_v47 = vsel %vm1407_vm13, %v1880_v58, %v1879_v14 }
 0x2af   :  { %v1859_v42 = vunpack.c.l.b16 %v1855_v11  ;;  %v1906_v37 = vrot.slane %v4636_v48, 5  ;;  %v1883_v13 = vsel %vm1410_vm14, %v1882_v0, %v1881_v47  ;;  %v1908_v7 = vrot.slane %v4638_v17, 4 }
 0x2b0   :  { %v1905_v53 = vsel %vm1401_vm11, %v1904_v45, %v1903_v39  ;;  %v1910_v22 = vrot.slane %v4728_v62, 3  ;;  %v1885_v5 = vsel %vm1413_vm15, %v4811_v63, %v1883_v13  ;;  %v1886_v1 = vrot.slane %v1857_v41, 1 }
 0x2b1   :  { %v1907_v25 = vsel %vm1404_vm12, %v1906_v37, %v1905_v53  ;;  %v1914_v16 = vrot.slane %v1859_v42, 1  ;;  %v1826_v2 = vrot.slane %v1818_v32, %v4291_v4  ;;  %v1848_v48 = vrot.slane %v1840_v35, %v4291_v4  ;;  %v3822_v53 = vld [vmem:[#allocation5 + $0x200] ss:$8 sps:$4 sm:$0xff]  }
 0x2b2   :  { %v1909_v3 = vsel %vm1407_vm13, %v1908_v7, %v1907_v25  ;;  %v1860_v40 = vrot.slane %v4371_v49, 7  ;;  %v4897_v28 = vsel %vm1416_vm0, %v1886_v1, %v1885_v5  ;;  %v1862_v62 = vrot.slane %v4381_v56, 6  ;;  %v3830_v5 = vld [vmem:[#allocation5 + $0x224] ss:$8 sps:$4 sm:$0xff]   ;;  %v3828_v25 = vld [vmem:[#allocation5 + $0x220] ss:$8 sps:$4 sm:$0xff]  }
 0x2b3   :  { %v1911_v17 = vsel %vm1410_vm14, %v1910_v22, %v1909_v3  ;;  %v1864_v63 = vrot.slane %v4385_v57, 5  ;;  %v1870_v19 = vrot.slane %v4678_v33, 2  ;;  %v1856_v24 = vunpack.c.l.b16 %v1826_v2  ;;  %v3825_v22 = vld [vmem:[#allocation5 + $0x210] ss:$8 sps:$4 sm:$0xff]   ;;  %v3836_v2 = vld [vmem:[#allocation5 + $0x244] ss:$8 sps:$4 sm:$0xff]  }
 0x2b4   :  { %v1913_v60 = vsel %vm1413_vm15, %v1912_v27, %v1911_v17  ;;  %v1861_v32 = vsel %vm1398_vm10, %v1860_v40, %v4361_v38  ;;  %v1866_v54 = vrot.slane %v4465_v52, 4  ;;  %v1888_v51 = vrot.slane %v4492_v44, 7 }
 0x2b5   :  { %v4907_v35 = vsel %vm1416_vm0, %v1914_v16, %v1913_v60  ;;  %v1863_v49 = vsel %vm1401_vm11, %v1862_v62, %v1861_v32  ;;  %v1872_v33 = vrot.slane %v1856_v24, 1  ;;  %v1890_v31 = vrot.slane %v4498_v23, 6 }
 0x2b6   :  { %v2080_v56 = vpack.c.b16 %v4907_v35, %v4897_v28  ;;  %v1865_v57 = vsel %vm1404_vm12, %v1864_v63, %v1863_v49  ;;  %v1858_v58 = vunpack.c.l.b16 %v1848_v48  ;;  %v1889_v59 = vsel %vm1398_vm10, %v1888_v51, %v4487_v36  ;;  %v3834_v63 = vld [vmem:[#allocation5 + $0x240] ss:$8 sps:$4 sm:$0xff]   ;;  %v3842_v49 = vld [vmem:[#allocation5 + $0x264] ss:$8 sps:$4 sm:$0xff]   ;;  %v3845_v51 = vld [vmem:[#allocation5 + $0x274] ss:$8 sps:$4 sm:$0xff]  }
 0x2b7   :  { %v1867_v38 = vsel %vm1407_vm13, %v1866_v54, %v1865_v57  ;;  %v1892_v20 = vrot.slane %v4520_v10, 5  ;;  %v1891_v44 = vsel %vm1401_vm11, %v1890_v31, %v1889_v59  ;;  %v1894_v0 = vrot.slane %v4543_v43, 4  ;;  %v3840_v54 = vld [vmem:[#allocation5 + $0x260] ss:$8 sps:$4 sm:$0xff]   ;;  %v3843_v57 = vld [vmem:[#allocation5 + $0x270] ss:$8 sps:$4 sm:$0xff]  }
 0x2b8   :  { %v1869_v52 = vsel %vm1410_vm14, %v1868_v29, %v1867_v38  ;;  %v1896_v9 = vrot.slane %v4589_v34, 3  ;;  %v1898_v11 = vrot.slane %v4721_v6, 2  ;;  %v1900_v29 = vrot.slane %v1858_v58, 1  ;;  %v3846_v31 = vld [vmem:[#allocation5 + $0x280] ss:$8 sps:$4 sm:$0xff]  }
 0x2b9   :  { %v1871_v23 = vsel %vm1413_vm15, %v1870_v19, %v1869_v52  ;;  %v1893_v46 = vsel %vm1404_vm12, %v1892_v20, %v1891_v44  ;;  %v1460_v6 = vpack.c.b16 %v4789_v15, %v4789_v15  ;;  %v1461_v14 = vpack.c.b16 %v4805_v55, %v4805_v55  ;;  %v3827_v55 = vld [vmem:[#allocation5 + $0x214] ss:$8 sps:$4 sm:$0xff]   ;;  %v3849_v38 = vld [vmem:[#allocation5 + $0x290] ss:$8 sps:$4 sm:$0xff]   ;;  %v3854_v59 = vld [vmem:[#allocation5 + $0x2a4] ss:$8 sps:$4 sm:$0xff]  }
 0x2ba   :  { %v4930_v36 = vsel %vm1416_vm0, %v1872_v33, %v1871_v23  ;;  %v1895_v10 = vsel %vm1407_vm13, %v1894_v0, %v1893_v46  ;;  %v1688_v16 = vpack.c.b16 %v4822_v30, %v4822_v30  ;;  %v1689_v3 = vpack.c.b16 %v4872_v50, %v4872_v50  ;;  %v3839_v19 = vld [vmem:[#allocation5 + $0x254] ss:$8 sps:$4 sm:$0xff]   ;;  %v3837_v50 = vld [vmem:[#allocation5 + $0x250] ss:$8 sps:$4 sm:$0xff]   ;;  %v3848_v33 = vld [vmem:[#allocation5 + $0x284] ss:$8 sps:$4 sm:$0xff]  }
 0x2bb   :  { %v1897_v8 = vsel %vm1410_vm14, %v1896_v9, %v1895_v10  ;;  %v3851_v58 = vld [vmem:[#allocation5 + $0x294] ss:$8 sps:$4 sm:$0xff]   ;;  %v3852_v20 = vld [vmem:[#allocation5 + $0x2a0] ss:$8 sps:$4 sm:$0xff]   ;;  %v3855_v44 = vld [vmem:[#allocation5 + $0x2b0] ss:$8 sps:$4 sm:$0xff]  }
 0x2bc   :  { %v1899_v26 = vsel %vm1413_vm15, %v1898_v11, %v1897_v8  ;;  %v3857_v52 = vld [vmem:[#allocation5 + $0x2b4] ss:$8 sps:$4 sm:$0xff]   ;;  %v3860_v0 = vld [vmem:[#allocation5 + $0x2c4] ss:$8 sps:$4 sm:$0xff]   ;;  %v3858_v9 = vld [vmem:[#allocation5 + $0x2c0] ss:$8 sps:$4 sm:$0xff]  }
 0x2bd   :  { %v4936_v43 = vsel %vm1416_vm0, %v1900_v29, %v1899_v26  ;;  %v3863_v23 = vld [vmem:[#allocation5 + $0x2d4] ss:$8 sps:$4 sm:$0xff]   ;;  %v3861_v46 = vld [vmem:[#allocation5 + $0x2d0] ss:$8 sps:$4 sm:$0xff]   ;;  %v3866_v11 = vld [vmem:[#allocation5 + $0x2e4] ss:$8 sps:$4 sm:$0xff]  }
 0x2be   :  { %v2079_v34 = vpack.c.b16 %v4936_v43, %v4930_v36  ;;  %v3864_v10 = vld [vmem:[#allocation5 + $0x2e0] ss:$8 sps:$4 sm:$0xff]   ;;  %v3869_v8 = vld [vmem:[#allocation5 + $0x2f4] ss:$8 sps:$4 sm:$0xff]   ;;  %v3867_v29 = vld [vmem:[#allocation5 + $0x2f0] ss:$8 sps:$4 sm:$0xff]  }
 0x2bf   :  { %v3872_v26 = vld [vmem:[#allocation5 + $0x304] ss:$8 sps:$4 sm:$0xff]   ;;  %v3885_v28 = vld [vmem:[#allocation5 + $0x350] ss:$8 sps:$4 sm:$0xff]  }
 0x2c0   :  { %v3890_v35 = vld [vmem:[#allocation5 + $0x364] ss:$8 sps:$4 sm:$0xff]  }
 0x2c1   :  { %v3915_v36 = vld [vmem:[#allocation7 + $0x20] sm:$0xff]   ;;  %v3916_v43 = vld [vmem:[#allocation7 + $0x68] sm:$0xff]  }
 0x2dd   :  { %v1573_v27 = vpop.permute.xlu0 %1572 }
 0x2de   :  { %v1919_v45 = vsel %vm633_vm9, %v1460_v6, %v1573_v27  ;;  %v3875_v6 = vld [vmem:[#allocation5 + $0x314] ss:$8 sps:$4 sm:$0xff]  }
 0x2e5   :  { %v1575_v47 = vpop.permute.xlu1 %1574 }
 0x2e6   :  { %v1580_v13 = vsel %vm633_vm9, %v1573_v27, %v1575_v47  ;;  %v3870_v27 = vld [vmem:[#allocation5 + $0x300] ss:$8 sps:$4 sm:$0xff]   ;;  %v3879_v47 = vld [vmem:[#allocation5 + $0x330] ss:$8 sps:$4 sm:$0xff]  }
 0x2e8   :  { %v1577_v39 = vpop.permute.xlu0 %1576 }
 0x2e9   :  { %v1922_v41 = vsel %vm633_vm9, %v1461_v14, %v1577_v39  ;;  %v3873_v14 = vld [vmem:[#allocation5 + $0x310] ss:$8 sps:$4 sm:$0xff]  }
 0x2ea   :  { %v3442_v42 = vcombine.low %v1919_v45, %v1922_v41  ;;  %v3876_v45 = vld [vmem:[#allocation5 + $0x320] ss:$8 sps:$4 sm:$0xff]   ;;  %v3881_v41 = vld [vmem:[#allocation5 + $0x334] ss:$8 sps:$4 sm:$0xff]  }
 0x2ec   :  { %2723 = vmatprep.mubr.bf16.mxu1 %v3442_v42  ;;  %v3906_v42 = vld [vmem:[#allocation7 + $0x40] sm:$0xff]  }
 0x2ed   :  { %2724 = vmatmul.mubr.bf16.vlgmr.msra.gmra.mrb[24].mxu1 %v2073_v12  ;;  %v3831_v12 = vld [vmem:[#allocation5 + $0x230] ss:$8 sps:$4 sm:$0xff]   ;;  %3608 = vmatprep.subr.bf16.mxu1 %v3906_v42 }
 0x2fa   :  { %v1579_v37 = vpop.permute.xlu1 %1578 }
 0x2fb   :  { %v1581_v15 = vsel %vm633_vm9, %v1577_v39, %v1579_v37  ;;  %v3878_v39 = vld [vmem:[#allocation5 + $0x324] ss:$8 sps:$4 sm:$0xff]  }
 0x2fc   :  { %v3443_v7 = vcombine.low %v1580_v13, %v1581_v15  ;;  %v3884_v37 = vld [vmem:[#allocation5 + $0x344] ss:$8 sps:$4 sm:$0xff]   ;;  %v3882_v13 = vld [vmem:[#allocation5 + $0x340] ss:$8 sps:$4 sm:$0xff]   ;;  %v3887_v15 = vld [vmem:[#allocation5 + $0x354] ss:$8 sps:$4 sm:$0xff]  }
 0x2fe   :  { %2767 = vmatmul.mubr.bf16.vlgmr.msra.gmra.mrb[0].mxu0 %v3443_v7  ;;  %v3891_v7 = vld [vmem:[#allocation5 + $0x370] ss:$8 sps:$4 sm:$0xff]  }
 0x2ff   :  { %2778 = vmatpush1.bf16.msra.mxu0 %v3822_v53  ;;  %v1801_v1 = vpop.permute.xlu0 %1800  ;;  %v3893_v53 = vld [vmem:[#allocation5 + $0x374] ss:$8 sps:$4 sm:$0xff]  }
 0x300   :  { %2779 = vmatprep.subr.bf16.mxu0 %v3827_v55  ;;  %v1925_v40 = vsel %vm633_vm9, %v1688_v16, %v1801_v1  ;;  %v3896_v55 = vld [vmem:[#allocation5 + $0x384] ss:$8 sps:$4 sm:$0xff]  }
 0x302   :  { %v1803_v21 = vpop.permute.xlu1 %1802 }
 0x303   :  { %2780 = vmatpush1.bf16.msra.mxu0 %v3825_v22  ;;  %v1808_v24 = vsel %vm633_vm9, %v1801_v1, %v1803_v21  ;;  %v3894_v22 = vld [vmem:[#allocation5 + $0x380] ss:$8 sps:$4 sm:$0xff]   ;;  %v3897_v1 = vld [vmem:[#allocation5 + $0x390] ss:$8 sps:$4 sm:$0xff]   ;;  %v3905_v21 = vld [vmem:[#allocation5 + $0x3b4] ss:$8 sps:$4 sm:$0xff]  }
 0x304   :  { %2781 = vmatprep.subr.bf16.mxu0 %v3830_v5  ;;  %v3899_v5 = vld [vmem:[#allocation5 + $0x394] ss:$8 sps:$4 sm:$0xff]  }
 0x307   :  { %2782 = vmatpush1.bf16.msra.mxu0 %v3828_v25  ;;  %v3902_v25 = vld [vmem:[#allocation5 + $0x3a4] ss:$8 sps:$4 sm:$0xff]  }
 0x308   :  { %2783 = vmatprep.subr.bf16.mxu0 %v3833_v18  ;;  %v3900_v18 = vld [vmem:[#allocation5 + $0x3a0] ss:$8 sps:$4 sm:$0xff]  }
 0x309   :  { %v1805_v48 = vpop.permute.xlu0 %1804 }
 0x30a   :  { %v1928_v17 = vsel %vm633_vm9, %v1689_v3, %v1805_v48 }
 0x30b   :  { %v3444_v62 = vcombine.low %v1925_v40, %v1928_v17  ;;  %2784 = vmatpush1.bf16.msra.mxu0 %v3831_v12  ;;  %v3903_v12 = vld [vmem:[#allocation5 + $0x3b0] ss:$8 sps:$4 sm:$0xff]   ;;  %v3908_v17 = vld [vmem:[#allocation7 + $0x48] sm:$0xff]  }
 0x30c   :  { %2785 = vmatprep.subr.bf16.mxu0 %v3836_v2 }
 0x30d   :  { %v1807_v60 = vpop.permute.xlu1 %1806 }
 0x30e   :  { %v1809_v30 = vsel %vm633_vm9, %v1805_v48, %v1807_v60  ;;  %v3907_v48 = vld [vmem:[#allocation7] sm:$0xff]   ;;  %v3912_v60 = vld [vmem:[#allocation7 + $0x58] sm:$0xff]  }
 0x30f   :  { %v3445_v32 = vcombine.low %v1808_v24, %v1809_v30  ;;  %2786 = vmatpush1.bf16.msra.mxu0 %v3834_v63  ;;  %3609 = vmatpush3.bf16.msra.mxu1 %v3907_v48  ;;  %v3910_v63 = vld [vmem:[#allocation7 + $0x50] sm:$0xff]   ;;  %v3913_v24 = vld [vmem:[#allocation7 + $0x18] sm:$0xff]   ;;  %v3914_v30 = vld [vmem:[#allocation7 + $0x60] sm:$0xff]  }
 0x310   :  { %2787 = vmatprep.subr.bf16.mxu0 %v3839_v19  ;;  %3610 = vmatprep.subr.bf16.mxu1 %v3908_v17  ;;  %v3911_v19 = vld [vmem:[#allocation7 + $0x10] sm:$0xff]  }
 0x311   :  { %2809 = vmatprep.mubr.bf16.mxu0 %v3445_v32  ;;  %v3918_v32 = vld [vmem:[#allocation7 + $0x70] sm:$0xff]  }
 0x313   :  { %2788 = vmatpush1.bf16.msra.mxu0 %v3837_v50  ;;  %v3919_v50 = vld [vmem:[#allocation7 + $0x30] sm:$0xff]  }
 0x314   :  { %2789 = vmatprep.subr.bf16.mxu0 %v3842_v49  ;;  %v3920_v49 = vld [vmem:[#allocation7 + $0x78] sm:$0xff]  }
 0x317   :  { %2790 = vmatpush1.bf16.msra.mxu0 %v3840_v54  ;;  %v3921_v54 = vld [vmem:[#allocation7 + $0x38] sm:$0xff]  }
 0x318   :  { %2791 = vmatprep.subr.bf16.mxu0 %v3845_v51  ;;  %v3922_v51 = vld [vmem:[#allocation7 + $0xc0] sm:$0xff]  }
 0x31b   :  { %2792 = vmatpush1.bf16.msra.mxu0 %v3843_v57  ;;  %v2061_v57 = vld [vmem:[%s5002_s4] sm:$0x3] }
 0x31c   :  { %2793 = vmatprep.subr.bf16.mxu0 %v3848_v33  ;;  %v5016_v33 = vsub.s32 0, %v4255_v61 }
 0x31f   :  { %2794 = vmatpush1.bf16.msra.mxu0 %v3846_v31  ;;  %v2066_v31 = vrot.slane %v2061_v57, %v5016_v33  ;;  %v3926_v33 = vld [vmem:[#allocation7 + $0xd0] sm:$0xff]  }
 0x320   :  { %2795 = vmatprep.subr.bf16.mxu0 %v3851_v58  ;;  %v5017_v58 = vsub.s32 1, %v4255_v61 }
 0x323   :  { %2796 = vmatpush1.bf16.msra.mxu0 %v3849_v38  ;;  %v2070_v38 = vrot.slane %v2061_v57, %v5017_v58  ;;  %v3925_v57 = vld [vmem:[#allocation7 + $0x88] sm:$0xff]   ;;  %v3928_v58 = vld [vmem:[#allocation7 + $0xd8] sm:$0xff]  }
 0x324   :  { %2797 = vmatprep.subr.bf16.mxu0 %v3854_v59 }
 0x327   :  { %2798 = vmatpush1.bf16.msra.mxu0 %v3852_v20 }
 0x328   :  { %2799 = vmatprep.subr.bf16.mxu0 %v3857_v52 }
 0x32b   :  { %2800 = vmatpush1.bf16.msra.mxu0 %v3855_v44 }
 0x32c   :  { %2801 = vmatprep.subr.bf16.mxu0 %v3860_v0 }
 0x32f   :  { %2802 = vmatpush1.bf16.msra.mxu0 %v3858_v9 }
 0x330   :  { %2803 = vmatprep.subr.bf16.mxu0 %v3863_v23 }
 0x333   :  { %2804 = vmatpush1.bf16.msra.mxu0 %v3861_v46 }
 0x334   :  { %2805 = vmatprep.subr.bf16.mxu0 %v3866_v11 }
 0x337   :  { %2806 = vmatpush1.bf16.msra.mxu0 %v3864_v10 }
 0x338   :  { %2807 = vmatprep.subr.bf16.mxu0 %v3869_v8 }
 0x33b   :  { %2808 = vmatpush1.bf16.msra.mxu0 %v3867_v29 }
 0x33c   :  { %2820 = vmatprep.subr.bf16.mxu0 %v3872_v26 }
 0x33e   :  { %2810 = vmatmul.mubr.bf16.vlgmr.msra.gmra.mrb[0].mxu0 %v3444_v62  ;;  %v3909_v62 = vld [vmem:[#allocation7 + $0x8] sm:$0xff]  }
 0x33f   :  { %2821 = vmatpush1.bf16.msra.mxu0 %v3870_v27  ;;  %3566 = vmatprep.mubr.msk.bf16.mxu0 %vm633_vm9, %v2080_v56  ;;  %v3888_v56 = vld [vmem:[#allocation5 + $0x360] ss:$8 sps:$4 sm:$0xff]  }
 0x340   :  { %2822 = vmatprep.subr.bf16.mxu0 %v3875_v6  ;;  %3611 = vmatpush3.bf16.msra.mxu1 %v3909_v62 }
 0x341   :  { %3612 = vmatprep.subr.bf16.mxu1 %v3910_v63 }
 0x343   :  { %2823 = vmatpush1.bf16.msra.mxu0 %v3873_v14 }
 0x344   :  { %2824 = vmatprep.subr.bf16.mxu0 %v3878_v39  ;;  %3613 = vmatpush3.bf16.msra.mxu1 %v3911_v19 }
 0x345   :  { %3614 = vmatprep.subr.bf16.mxu1 %v3912_v60 }
 0x347   :  { %2825 = vmatpush1.bf16.msra.mxu0 %v3876_v45 }
 0x348   :  { %2826 = vmatprep.subr.bf16.mxu0 %v3881_v41  ;;  %3615 = vmatpush3.bf16.msra.mxu1 %v3913_v24 }
 0x349   :  { %3616 = vmatprep.subr.bf16.mxu1 %v3914_v30 }
 0x34b   :  { %2827 = vmatpush1.bf16.msra.mxu0 %v3879_v47 }
 0x34c   :  { %2828 = vmatprep.subr.bf16.mxu0 %v3884_v37  ;;  %3617 = vmatpush3.bf16.msra.mxu1 %v3915_v36 }
 0x34d   :  { %3618 = vmatprep.subr.bf16.mxu1 %v3916_v43 }
 0x34f   :  { %2829 = vmatpush1.bf16.msra.mxu0 %v3882_v13 }
 0x350   :  { %2830 = vmatprep.subr.bf16.mxu0 %v3887_v15 }
 0x353   :  { %2831 = vmatpush1.bf16.msra.mxu0 %v3885_v28 }
 0x354   :  { %2832 = vmatprep.subr.bf16.mxu0 %v3890_v35 }
 0x357   :  { %2833 = vmatpush1.bf16.msra.mxu0 %v3888_v56 }
 0x358   :  { %2834 = vmatprep.subr.bf16.mxu0 %v3893_v53 }
 0x35b   :  { %2835 = vmatpush1.bf16.msra.mxu0 %v3891_v7 }
 0x35c   :  { %2836 = vmatprep.subr.bf16.mxu0 %v3896_v55 }
 0x35f   :  { %2837 = vmatpush1.bf16.msra.mxu0 %v3894_v22 }
 0x360   :  { %2838 = vmatprep.subr.bf16.mxu0 %v3899_v5 }
 0x363   :  { %2839 = vmatpush1.bf16.msra.mxu0 %v3897_v1 }
 0x364   :  { %2840 = vmatprep.subr.bf16.mxu0 %v3902_v25 }
 0x367   :  { %2841 = vmatpush1.bf16.msra.mxu0 %v3900_v18 }
 0x368   :  { %2842 = vmatprep.subr.bf16.mxu0 %v3905_v21 }
 0x36b   :  { %2843 = vmatpush1.bf16.msra.mxu0 %v3903_v12 }
 0x36e   :  { %2853 = vmatmul.mubr.bf16.vlgmr.msra.gmra.mrb[0].mxu0 %v2079_v34  ;;  %v3917_v34 = vld [vmem:[#allocation7 + $0x28] sm:$0xff]  }
 0x36f   :  { %3619 = vmatpush3.bf16.msra.mxu1 %v3917_v34 }
 0x370   :  { %3620 = vmatprep.subr.bf16.mxu1 %v3918_v32  ;;  %v3923_v32 = vld [vmem:[#allocation7 + $0x80] sm:$0xff]  }
 0x373   :  { %3621 = vmatpush3.bf16.msra.mxu1 %v3919_v50 }
 0x374   :  { %3622 = vmatprep.subr.bf16.mxu1 %v3920_v49 }
 0x377   :  { %3623 = vmatpush3.bf16.msra.mxu1 %v3921_v54  ;;  %v3924_v54 = vld [vmem:[#allocation7 + $0xc8] sm:$0xff]  }
 0x378   :  { %3630 = vmatprep.subr.bf16.mxu1 %v3922_v51 }
 0x3c0   :  { %v2725_v16 = vpop.f32.mrb[24].mxu1 }
 0x3c1   :  { %v2727_v3 = vpop.f32.mrb[25].mxu1  ;;  %v2726_v59 = vadd.f32 %v2725_v16, %v2066_v31 }
 0x3c2   :  { %v2729_v2 = vpop.f32.mrb[26].mxu1  ;;  %v2728_v20 = vadd.f32 %v2727_v3, %v2070_v38 }
 0x3c3   :  { %v2731_v40 = vpop.f32.mrb[27].mxu1  ;;  %v2730_v44 = vadd.f32 %v2729_v2, %v2066_v31  ;;  %v3927_v31 = vld [vmem:[#allocation7 + $0x90] sm:$0xff]  }
 0x3c4   :  { %v2732_v23 = vadd.f32 %v2731_v40, %v2070_v38 }
 0x441   :  { %v2854_v52 = vpop.f32.mrb[0].mxu0 }
 0x442   :  { %v3653_v0 = vadd.f32 %v2854_v52, %v2726_v59  ;;  %v2856_v9 = vpop.f32.mrb[1].mxu0  ;;  %v3929_v59 = vld [vmem:[#allocation7 + $0x98] sm:$0xff]  }
 0x443   :  { %v3655_v46 = vadd.f32 %v2856_v9, %v2728_v20  ;;  %v2858_v11 = vpop.f32.mrb[2].mxu0  ;;  %v3930_v20 = vld [vmem:[#allocation7 + $0xe0] sm:$0xff]   ;;  %v3932_v9 = vld [vmem:[#allocation7 + $0xe8] sm:$0xff]  }
 0x444   :  { %v3657_v10 = vadd.f32 %v2858_v11, %v2730_v44  ;;  %v2860_v8 = vpop.f32.mrb[3].mxu0  ;;  %v2863_v26 = vmax.f32 %v3653_v0, 0.0  ;;  %v3931_v0 = vld [vmem:[#allocation7 + $0xa0] sm:$0xff]  }
 0x445   :  { %v3659_v29 = vadd.f32 %v2860_v8, %v2732_v23  ;;  %v2864_v6 = vmax.f32 %v3655_v46, 0.0  ;;  %v3933_v46 = vld [vmem:[#allocation7 + $0xa8] sm:$0xff]  }
 0x446   :  { %v2865_v27 = vmax.f32 %v3657_v10, 0.0  ;;  %v3934_v10 = vld [vmem:[#allocation7 + $0xf0] sm:$0xff]  }
 0x447   :  { %v2866_v14 = vmax.f32 %v3659_v29, 0.0  ;;  %v3935_v29 = vld [vmem:[#allocation7 + $0xb0] sm:$0xff]  }
 0x448   :  { %v2867_v39 = vpack.c.bf16 %v2865_v27, %v2863_v26  ;;  %v3936_v27 = vld [vmem:[#allocation7 + $0xf8] sm:$0xff]  }
 0x449   :  { %v2868_v45 = vpack.c.bf16 %v2866_v14, %v2864_v6  ;;  %v3937_v14 = vld [vmem:[#allocation7 + $0xb8] sm:$0xff]  }
 0x44b   :  { %v2869_v61 = vmax.bf16 %v2868_v45, %v2867_v39 }
 0x44d   :  { %v2871_v41 = vcombine.high %v2869_v61, %v2869_v61  ;;  %v2878_v42 = vrot.slane %v2869_v61, %v4291_v4 }
 0x44f   :  { %v2885_v47 = vrot.slane %v2871_v41, %v4291_v4  ;;  %v2886_v37 = vcombine.high %v2878_v42, %v2878_v42  ;;  %v2894_v13 = vrot.slane %v2878_v42, %v4291_v4 }
 0x451   :  { %v2887_v15 = vcombine.high %v2885_v47, %v2885_v47  ;;  %v2901_v28 = vrot.slane %v2885_v47, %v4291_v4  ;;  %v2908_v35 = vrot.slane %v2886_v37, %v4291_v4  ;;  %v2929_v56 = vshrl.u32 %v2894_v13, 16 }
 0x452   :  { %v2916_v44 = vcombine.high %v2894_v13, %v2894_v13 }
 0x453   :  { %v2915_v53 = vrot.slane %v2887_v15, %v4291_v4  ;;  %v2934_v7 = vshrl.u32 %v2908_v35, 16  ;;  %v2949_v55 = vshrl.u32 %v2901_v28, 16  ;;  %v2918_v22 = vcombine.high %v2908_v35, %v2908_v35  ;;  %v3575_v15 = vld [vmem:[%s5004_s6] ss:$0 sm:$0xff] }
 0x454   :  { %v2976_v18 = vmax.bf16 %v2929_v56, %v2894_v13  ;;  %v2917_v38 = vcombine.high %v2901_v28, %v2901_v28  ;;  %v2939_v11 = vshrl.u32 %v2916_v44, 16 }
 0x455   :  { %v2954_v5 = vshrl.u32 %v2915_v53, 16  ;;  %v2980_v1 = vmax.bf16 %v2949_v55, %v2901_v28  ;;  %v2919_v25 = vcombine.high %v2915_v53, %v2915_v53  ;;  %v2944_v21 = vshrl.u32 %v2918_v22, 16 }
 0x456   :  { %v2977_v12 = vmax.bf16 %v2934_v7, %v2908_v35  ;;  %v3063_v63 = vunpack.c.l.b16 %v2976_v18  ;;  %v2959_v52 = vshrl.u32 %v2917_v38, 16  ;;  %v2978_v26 = vmax.bf16 %v2939_v11, %v2916_v44 }
 0x457   :  { %v2981_v16 = vmax.bf16 %v2954_v5, %v2915_v53  ;;  %v3067_v3 = vunpack.c.l.b16 %v2980_v1  ;;  %v2964_v2 = vshrl.u32 %v2919_v25, 16  ;;  %v2979_v17 = vmax.bf16 %v2944_v21, %v2918_v22 }
 0x458   :  { %v3064_v19 = vunpack.c.l.b16 %v2977_v12  ;;  %v2982_v23 = vmax.bf16 %v2959_v52, %v2917_v38  ;;  %v3065_v39 = vunpack.c.l.b16 %v2978_v26 }
 0x459   :  { %v3068_v48 = vunpack.c.l.b16 %v2981_v16  ;;  %v3071_v40 = vrot.slane %v3067_v3, 7  ;;  %v2983_v62 = vmax.bf16 %v2964_v2, %v2919_v25  ;;  %v3066_v36 = vunpack.c.l.b16 %v2979_v17 }
 0x45a   :  { %v3069_v8 = vunpack.c.l.b16 %v2982_v23 }
 0x45b   :  { %v3073_v60 = vrot.slane %v3068_v48, 7  ;;  %v3070_v4 = vunpack.c.l.b16 %v2983_v62  ;;  %v3072_v24 = vsel %vm1398_vm10, %v3071_v40, %v3063_v63 }
 0x45c   :  { %v3079_v50 = vpack.c.b16 %v3072_v24, %v3072_v24  ;;  %v3075_v6 = vrot.slane %v3069_v8, 7 }
 0x45d   :  { %v3074_v30 = vsel %vm1398_vm10, %v3073_v60, %v3064_v19  ;;  %v3077_v43 = vrot.slane %v3070_v4, 7 }
 0x45e   :  { %v3080_v34 = vpack.c.b16 %v3074_v30, %v3074_v30  ;;  %v3076_v45 = vsel %vm1398_vm10, %v3075_v6, %v3065_v39 }
 0x45f   :  { %v3078_v49 = vsel %vm1398_vm10, %v3077_v43, %v3066_v36  ;;  %v3081_v61 = vpack.c.b16 %v3076_v45, %v3076_v45 }
 0x460   :  { %3311 = vmatprep.mubr.bf16.mxu1 %v3080_v34  ;;  %v3082_v51 = vpack.c.b16 %v3078_v49, %v3078_v49 }
 0x461   :  { %3312 = vmatmul.mubr.bf16.vlgmr.msra.gmra.mrb[28].mxu1 %v3079_v50 }
 0x462   :  { %3631 = vmatpush3.bf16.msra.mxu1 %v3923_v32  ;;  %3351 = vmatprep.mubr.bf16.mxu1 %v3082_v51 }
 0x463   :  { %3632 = vmatprep.subr.bf16.mxu1 %v3924_v54 }
 0x466   :  { %3633 = vmatpush3.bf16.msra.mxu1 %v3925_v57 }
 0x467   :  { %3634 = vmatprep.subr.bf16.mxu1 %v3926_v33 }
 0x46a   :  { %3635 = vmatpush3.bf16.msra.mxu1 %v3927_v31 }
 0x46b   :  { %3636 = vmatprep.subr.bf16.mxu1 %v3928_v58 }
 0x46e   :  { %3637 = vmatpush3.bf16.msra.mxu1 %v3929_v59 }
 0x46f   :  { %3638 = vmatprep.subr.bf16.mxu1 %v3930_v20 }
 0x472   :  { %3639 = vmatpush3.bf16.msra.mxu1 %v3931_v0 }
 0x473   :  { %3640 = vmatprep.subr.bf16.mxu1 %v3932_v9 }
 0x476   :  { %3641 = vmatpush3.bf16.msra.mxu1 %v3933_v46 }
 0x477   :  { %3642 = vmatprep.subr.bf16.mxu1 %v3934_v10 }
 0x47a   :  { %3643 = vmatpush3.bf16.msra.mxu1 %v3935_v29 }
 0x47b   :  { %3644 = vmatprep.subr.bf16.mxu1 %v3936_v27 }
 0x47e   :  { %3645 = vmatpush3.bf16.msra.mxu1 %v3937_v14 }
 0x481   :  { %3352 = vmatmul.mubr.bf16.vlgmr.msra.gmra.mrb[32].mxu1 %v3081_v61 }
 0x534   :  { %v3624_v41 = vpop.f32.mrb[28].mxu1 }
 0x535   :  { %v3625_v42 = vpop.f32.mrb[29].mxu1 }
 0x536   :  { %v3626_v47 = vadd.f32 %v3625_v42, %v3624_v41  ;;  %v3627_v37 = vpop.f32.mrb[30].mxu1 }
 0x537   :  { %v3628_v13 = vpop.f32.mrb[31].mxu1 }
 0x538   :  { %v3314_v56 = vadd.f32 %v3626_v47, %v3575_v15 }
 0x554   :  { %v3646_v28 = vpop.f32.mrb[32].mxu1 }
 0x555   :  { %v3647_v35 = vpop.f32.mrb[33].mxu1 }
 0x556   :  { %v3648_v53 = vadd.f32 %v3647_v35, %v3646_v28  ;;  %v3649_v7 = vpop.f32.mrb[34].mxu1 }
 0x557   :  { %v3650_v55 = vpop.f32.mrb[35].mxu1 }
 0x558   :  { %v3354_v22 = vadd.f32 %v3648_v53, %v3314_v56 }
 0x55a   :  { %3359 = vst [vmem:[#allocation8] sm:$0x3] %v3354_v22 }
 0x55b   :  { %4015 = shalt.err (!%p4012_p0)
}
 0x55c   :  { %s4016_s15 = scalar_lea.hbm %s5005_s7, 32 }
 0x55d   :  { %p4017_p1 = scmp.ne.s32.totalorder %s5005_s7, %s4016_s15  ;;  %p4020_p2 = scmp.lt.u32.totalorder %s4016_s15, %s5005_s7 }
 0x55f   :  { %p4022_p3 = pnand %p4020_p2, %p4017_p1 }
 0x561   :  { %4025 = shalt.err (!%p4022_p3)
}
 0x562   :  { %3369 = dma.vmem_to_hbm [thread:$0]  %s3367_s13, 32, %s5005_s7, [#allocation4]  }
 0x563   :  { %4030 = dma.done.wait [#allocation4], 32  }
 0x564   :  { %4031 = vsyncadd [#allocation4], 4294967264 }
 0x565   :  { %3373 = vsyncpa [#allocation3], 1 }
 0x566   :  { %3374 = vsyncpa [#allocation6], 1 }
 0x567   :  { %3375 = vsyncpa [#allocation4], 1 }

</bundles_post_ra>
